<compile_context>
chip_gen: v7x
topology: tpu7x:2x2x1
jax: 0.10.0
libtpu: 0.0.40
codegen_flags: <defaults>
</compile_context>

<pallas_src>
import functools

import numpy as np
import jax
import jax.numpy as jnp
from jax.experimental import pallas as pl
from jax.experimental.pallas import tpu as pltpu

LN_EPS = 1e-5   # nn.LayerNorm default
GN_EPS = 1e-5   # nn.GroupNorm default

VMEM_LIMIT_BYTES = 48 * 1024 * 1024   # explicit scoped-VMEM limit with headroom (< v7x 64 MiB)


# ----------------------------------------------------------------------------
# Pallas kernels
# ----------------------------------------------------------------------------
def input_proj_kernel(x_ref, w_ref, b_ref, o_ref):
    """Row-tiled Linear: (TM, in) @ (in, hidden) + bias -> bf16."""
    xb = x_ref[...].astype(jnp.bfloat16)
    o_ref[...] = (jnp.dot(xb, w_ref[...], preferred_element_type=jnp.float32)
                  + b_ref[...]).astype(o_ref.dtype)


def qkv_gate_kernel(x_ref, ln1w_ref, ln1b_ref, wqkv_ref, wg_ref,
                    cq_ref, sq_ref, ck_ref, sk_ref,
                    qx_ref, kx_ref, v_ref, g_ref, *, heads, head_size, head_v_dim):
    """Row/seq-tiled: LN1 + all-head QKV projection + xpos + swish gate.

    Emits per-head tensors in head-major layout (H, Ts, d) so the retention core only
    ever touches lane-dense, full-width per-head blocks.
    rotate_every_two is folded into extra weight columns (exact: signed permutation).
    """
    H, hs, hv = heads, head_size, head_v_dim
    x = x_ref[...].astype(jnp.float32)

    # fused LayerNorm 1 (f32 statistics)
    mean = jnp.mean(x, axis=-1, keepdims=True)
    var = jnp.mean((x - mean) ** 2, axis=-1, keepdims=True)
    xn = (x - mean) * jax.lax.rsqrt(var + LN_EPS) * ln1w_ref[...] + ln1b_ref[...]
    xnb = xn.astype(jnp.bfloat16)

    # all heads' Q | rot2(Q) | K | rot2(K) | V in one lane-dense matmul
    qkv = jnp.dot(xnb, wqkv_ref[...], preferred_element_type=jnp.float32)
    Hs = H * hs
    q, qr = qkv[:, 0:Hs], qkv[:, Hs:2 * Hs]
    k, kr = qkv[:, 2 * Hs:3 * Hs], qkv[:, 3 * Hs:4 * Hs]
    v = qkv[:, 4 * Hs:4 * Hs + H * hv]

    # xpos (cos/sin/scale tables pre-tiled across heads): x*cos*scale + rot2(x)*sin*scale
    qx = (q * cq_ref[...] + qr * sq_ref[...]).astype(jnp.bfloat16)
    kx = (k * ck_ref[...] + kr * sk_ref[...]).astype(jnp.bfloat16)
    vb = v.astype(jnp.bfloat16)

    # swish gate = z * sigmoid(z),  z = LN1(x) @ W_G
    gf = jnp.dot(xnb, wg_ref[...], preferred_element_type=jnp.float32)
    gf = gf * (1.0 / (1.0 + jnp.exp(-gf)))
    gb = gf.astype(jnp.bfloat16)

    for h in range(H):                       # static loop: stores only, no live compute state
        qx_ref[h] = qx[:, h * hs:(h + 1) * hs]
        kx_ref[h] = kx[:, h * hs:(h + 1) * hs]
        v_ref[h] = vb[:, h * hv:(h + 1) * hv]
        g_ref[h] = gb[:, h * hv:(h + 1) * hv]


def retention_core_kernel(x_ref, qx_ref, kx_ref, v_ref, g_ref, lg_ref,
                          gnw_ref, gnb_ref, wo_ref, out_ref,
                          acc_ref, oacc_ref, *, block_t):
    """Flash-style retention core.  Grid = (B, q_blocks, H, k_blocks).

    For each (batch, q-block): loop heads x causal k-blocks, accumulating
    acc = sum_k (Qx Kx^T * D_block) V into a (Tq, hv) f32 scratch; at the last k-block,
    apply per-head GroupNorm + gate and accumulate the head's W_O contribution (plus the
    residual at head 0) into a (Tq, hidden) f32 output accumulator.
    """
    qi = pl.program_id(1)
    h = pl.program_id(2)
    ki = pl.program_id(3)
    n_heads = pl.num_programs(2)
    n_kblk = pl.num_programs(3)

    @pl.when(ki == 0)
    def _init():
        acc_ref[...] = jnp.zeros_like(acc_ref)

    # causal skip: k-blocks strictly after the q-block contribute nothing
    @pl.when(ki <= qi)
    def _accumulate():
        lg = lg_ref[...]                                     # (1, 1)  log(gamma_h)
        row = jax.lax.broadcasted_iota(jnp.int32, (block_t, 1), 0)
        col = jax.lax.broadcasted_iota(jnp.int32, (1, block_t), 1)
        n_rel = (qi - ki) * block_t + row                    # query pos rel. to k-block start
        # D[n, m] = gamma^(n-m) for n>=m else 0, factorized: exp(n_rel*lg) * exp(-m_rel*lg)
        row_f = jnp.exp(n_rel.astype(jnp.float32) * lg)      # (Tq, 1)
        col_f = jnp.exp(col.astype(jnp.float32) * (-lg))     # (1, Tk)
        decay = jnp.where(n_rel >= col, row_f * col_f, 0.0)  # (Tq, Tk)

        att = jax.lax.dot_general(qx_ref[...], kx_ref[...],
                                  (((1,), (1,)), ((), ())),
                                  preferred_element_type=jnp.float32)   # (Tq, Tk)
        att = att * decay
        acc_ref[...] += jnp.dot(att.astype(jnp.bfloat16), v_ref[...],
                                preferred_element_type=jnp.float32)     # (Tq, hv)

    @pl.when(ki == n_kblk - 1)
    def _finalize():
        # fused GroupNorm(heads, v_dim): this head's hv channels form one group
        y = acc_ref[...]
        gm = jnp.mean(y, axis=-1, keepdims=True)
        gv = jnp.mean((y - gm) ** 2, axis=-1, keepdims=True)
        yn = (y - gm) * jax.lax.rsqrt(gv + GN_EPS) * gnw_ref[...] + gnb_ref[...]

        gated = (yn * g_ref[...].astype(jnp.float32)).astype(jnp.bfloat16)
        contrib = jnp.dot(gated, wo_ref[...], preferred_element_type=jnp.float32)

        @pl.when(h == 0)
        def _():
            oacc_ref[...] = x_ref[...].astype(jnp.float32)   # residual

        oacc_ref[...] += contrib

        @pl.when(h == n_heads - 1)
        def _():
            out_ref[...] = oacc_ref[...].astype(out_ref.dtype)


def ffn_kernel(y_ref, lnw_ref, lnb_ref, w1_ref, b1_ref, w2_ref, b2_ref, o_ref):
    """Row-tiled: X = FFN(LN2(Y)) + Y  with LN2 fused (bf16 in/out, f32 stats)."""
    y = y_ref[...].astype(jnp.float32)
    mean = jnp.mean(y, axis=-1, keepdims=True)
    var = jnp.mean((y - mean) ** 2, axis=-1, keepdims=True)
    yn = (y - mean) * jax.lax.rsqrt(var + LN_EPS) * lnw_ref[...] + lnb_ref[...]

    hmid = (jnp.dot(yn.astype(jnp.bfloat16), w1_ref[...],
                    preferred_element_type=jnp.float32) + b1_ref[...])
    # TODO(synk): PyTorch nn.GELU() default is exact (erf); tanh approximation used here.
    hmid = jax.nn.gelu(hmid, approximate=True)
    out = (jnp.dot(hmid.astype(jnp.bfloat16), w2_ref[...],
                   preferred_element_type=jnp.float32) + b2_ref[...] + y)
    o_ref[...] = out.astype(o_ref.dtype)


def vae_head_kernel(x_ref, nw_ref, nb_ref, wh_ref, bh_ref, o_ref, *, latent):
    """Row-tiled: final LayerNorm fused with the concatenated [mu | logvar] head.

    Emits one lane-dense [mu | std] slab (split outside the kernel).
    """
    x = x_ref[...].astype(jnp.float32)
    mean = jnp.mean(x, axis=-1, keepdims=True)
    var = jnp.mean((x - mean) ** 2, axis=-1, keepdims=True)
    hn = (x - mean) * jax.lax.rsqrt(var + LN_EPS) * nw_ref[...] + nb_ref[...]

    raw = (jnp.dot(hn.astype(jnp.bfloat16), wh_ref[...],
                   preferred_element_type=jnp.float32) + bh_ref[...])   # [mu_raw | logvar_raw]
    z = 0.5 * raw
    # numerically stable softplus (matches F.softplus semantics) + 0.001
    sp = jnp.maximum(z, 0.0) + jnp.log(1.0 + jnp.exp(-jnp.abs(z))) + 0.001
    col = jax.lax.broadcasted_iota(jnp.int32, raw.shape, 1)
    o_ref[...] = jnp.where(col < latent, raw, sp)           # [mu | std] in one store


# ----------------------------------------------------------------------------
# pallas_call wrappers
# ----------------------------------------------------------------------------
def _pick_tile(n, target):
    """Largest multiple-of-8 divisor of n that is <= target (or n itself)."""
    if n <= target:
        return n
    t = (target // 8) * 8
    while t >= 8:
        if n % t == 0:
            return t
        t -= 8
    return n


def _row_tiled_call(kernel, x, shared, out_feat, out_dtype, tile_m):
    """Tile the leading (row) axis of `x`; `shared` args are whole-array (weights)."""
    m, fx = x.shape
    in_specs = [pl.BlockSpec((tile_m, fx), lambda i: (i, 0))]
    # TODO(synk): pipeline_mode=pl.Buffered(1) on these constant-index weight specs would
    # single-buffer them and halve their resident VMEM.
    in_specs += [pl.BlockSpec(a.shape, lambda i, nd=a.ndim: (0,) * nd) for a in shared]
    return pl.pallas_call(
        kernel,
        grid=(m // tile_m,),
        in_specs=in_specs,
        out_specs=pl.BlockSpec((tile_m, out_feat), lambda i: (i, 0)),
        out_shape=jax.ShapeDtypeStruct((m, out_feat), out_dtype),
        compiler_params=pltpu.CompilerParams(
            dimension_semantics=("parallel",),
            vmem_limit_bytes=VMEM_LIMIT_BYTES),
    )(x, *shared)


def qkv_gate_proj(x_bsd, layer, consts, seq_tile):
    """x: (B, S, hidden) bf16 -> per-head QX, KX, V, G  each (B, H, S, d) bf16."""
    B, S, hidden = x_bsd.shape
    H = consts["log_gammas"].shape[0]
    hs = consts["cos_q"].shape[1] // H
    v_dim = layer["w_g"].shape[1]
    hv = v_dim // H
    qkv_cols = layer["wqkv"].shape[1]
    Ts = seq_tile

    kernel = functools.partial(qkv_gate_kernel, heads=H, head_size=hs, head_v_dim=hv)
    wide = pl.BlockSpec((Ts, H * hs), lambda b, s: (s, 0))

    return pl.pallas_call(
        kernel,
        grid=(B, S // Ts),
        in_specs=[
            pl.BlockSpec((None, Ts, hidden), lambda b, s: (b, s, 0)),     # x
            pl.BlockSpec((1, hidden), lambda b, s: (0, 0)),               # ln1 weight
            pl.BlockSpec((1, hidden), lambda b, s: (0, 0)),               # ln1 bias
            pl.BlockSpec((hidden, qkv_cols), lambda b, s: (0, 0)),        # [Wq|WqR|Wk|WkR|Wv] bf16
            pl.BlockSpec((hidden, v_dim), lambda b, s: (0, 0)),           # W_G bf16
            wide, wide, wide, wide,                                       # cos_q/sin_q/cos_k/sin_k
        ],
        out_specs=[
            pl.BlockSpec((None, H, Ts, hs), lambda b, s: (b, 0, s, 0)),   # QX
            pl.BlockSpec((None, H, Ts, hs), lambda b, s: (b, 0, s, 0)),   # KX
            pl.BlockSpec((None, H, Ts, hv), lambda b, s: (b, 0, s, 0)),   # V
            pl.BlockSpec((None, H, Ts, hv), lambda b, s: (b, 0, s, 0)),   # gate
        ],
        out_shape=[
            jax.ShapeDtypeStruct((B, H, S, hs), jnp.bfloat16),
            jax.ShapeDtypeStruct((B, H, S, hs), jnp.bfloat16),
            jax.ShapeDtypeStruct((B, H, S, hv), jnp.bfloat16),
            jax.ShapeDtypeStruct((B, H, S, hv), jnp.bfloat16),
        ],
        compiler_params=pltpu.CompilerParams(
            dimension_semantics=("parallel", "parallel"),
            vmem_limit_bytes=VMEM_LIMIT_BYTES),
    )(x_bsd, layer["ln1_w"], layer["ln1_b"], layer["wqkv"], layer["w_g"],
      consts["cos_q"], consts["sin_q"], consts["cos_k"], consts["sin_k"])


def retention_core(x_bsd, qx, kx, v, g, layer, consts, blk_t):
    """(B, S, hidden) bf16 -> (B, S, hidden) bf16 = MSR(LN1(x)) + x (flash-style blocked)."""
    B, S, hidden = x_bsd.shape
    H, hs = qx.shape[1], qx.shape[3]
    hv = v.shape[3]
    nQ = S // blk_t
    nK = nQ

    kernel = functools.partial(retention_core_kernel, block_t=blk_t)

    return pl.pallas_call(
        kernel,
        grid=(B, nQ, H, nK),
        in_specs=[
            pl.BlockSpec((None, blk_t, hidden), lambda b, q, h, k: (b, q, 0)),            # x (residual)
            pl.BlockSpec((None, None, blk_t, hs), lambda b, q, h, k: (b, h, q, 0)),       # QX (q block)
            # clamp the k-block index to the causal range so skipped blocks re-use the
            # previous buffer (no wasted DMA for k-blocks after the q-block)
            pl.BlockSpec((None, None, blk_t, hs),
                         lambda b, q, h, k: (b, h, jnp.minimum(k, q), 0)),                # KX (k block)
            pl.BlockSpec((None, None, blk_t, hv),
                         lambda b, q, h, k: (b, h, jnp.minimum(k, q), 0)),                # V  (k block)
            pl.BlockSpec((None, None, blk_t, hv), lambda b, q, h, k: (b, h, q, 0)),       # gate (q block)
            pl.BlockSpec((None, 1, 1), lambda b, q, h, k: (h, 0, 0)),                     # log(gamma_h)
            pl.BlockSpec((None, 1, hv), lambda b, q, h, k: (h, 0, 0)),                    # GroupNorm w
            pl.BlockSpec((None, 1, hv), lambda b, q, h, k: (h, 0, 0)),                    # GroupNorm b
            pl.BlockSpec((None, hv, hidden), lambda b, q, h, k: (h, 0, 0)),               # W_O (head slab)
        ],
        out_specs=pl.BlockSpec((None, blk_t, hidden), lambda b, q, h, k: (b, q, 0)),
        out_shape=jax.ShapeDtypeStruct((B, S, hidden), jnp.bfloat16),
        scratch_shapes=[pltpu.VMEM((blk_t, hv), jnp.float32),        # per-head retention acc
                        pltpu.VMEM((blk_t, hidden), jnp.float32)],   # output accumulator
        compiler_params=pltpu.CompilerParams(
            dimension_semantics=("parallel", "parallel", "arbitrary", "arbitrary"),
            vmem_limit_bytes=VMEM_LIMIT_BYTES),
    )(x_bsd, qx, kx, v, g, consts["log_gammas"],
      layer["gn_w"], layer["gn_b"], layer["w_o"])


def retnet_encoder_forward(x, params, consts):
    """x: (B, S, input_dim) -> (mu, std), each (B, S, latent_dim)."""
    B, S, input_dim = x.shape
    hidden = params["b_in"].shape[1]
    two_latent = params["b_head"].shape[1]
    latent = two_latent // 2
    M = B * S

    tile_m = _pick_tile(M, 512)       # row tile for mem-bound row kernels
    seq_tile = _pick_tile(S, 512)     # sequence tile for the qkv/gate kernel
    ret_tile = _pick_tile(S, 256)     # q/k block size for the retention core

    # input projection (row-tiled, bf16 activations out)
    X = _row_tiled_call(input_proj_kernel, x.reshape(M, input_dim),
                        [params["w_in"], params["b_in"]], hidden, jnp.bfloat16, tile_m)
    X = X.reshape(B, S, hidden)

    for layer in params["layers"]:
        # LN1 + QKV (+rot) + xpos + gate, head-major per-head outputs
        qx, kx, v, g = qkv_gate_proj(X, layer, consts, seq_tile)
        # Y = MSR(LN1(X)) + X  (flash-style blocked retention core)
        Y = retention_core(X, qx, kx, v, g, layer, consts, ret_tile)
        # X = FFN(LN2(Y)) + Y  (row-tiled, LN2 fused)
        Xf = _row_tiled_call(
            ffn_kernel, Y.reshape(M, hidden),
            [layer["ln2_w"], layer["ln2_b"],
             layer["ffn_w1"], layer["ffn_b1"],
             layer["ffn_w2"], layer["ffn_b2"]],
            hidden, jnp.bfloat16, tile_m)
        X = Xf.reshape(B, S, hidden)

    # final LayerNorm + VAE heads, single lane-dense [mu | std] output slab
    head_kernel = functools.partial(vae_head_kernel, latent=latent)
    out = _row_tiled_call(head_kernel, X.reshape(M, hidden),
                          [params["norm_w"], params["norm_b"],
                           params["w_head"], params["b_head"]],
                          two_latent, jnp.float32, tile_m)
    mu = out[:, :latent].reshape(B, S, latent)
    std = out[:, latent:].reshape(B, S, latent)
    return mu, std


# ----------------------------------------------------------------------------
# deterministic parameter / constant setup (glue)
# ----------------------------------------------------------------------------
def _rot2_matrix(head_size):
    """R s.t. x @ R == rotate_every_two(x): out[2j] = -x[2j+1], out[2j+1] = x[2j]."""
    R = np.zeros((head_size, head_size), np.float32)
    for j in range(head_size // 2):
        R[2 * j + 1, 2 * j] = -1.0
        R[2 * j, 2 * j + 1] = 1.0
    return R


def init_params(key, input_dim, latent_dim, hidden_dim, layers, ffn_size, heads):
    hs = hidden_dim // heads
    v_dim = hidden_dim               # double_v_dim = False
    hv = v_dim // heads
    keys = iter(jax.random.split(key, 8 + 12 * layers))

    def lin(fan_in, fan_out):
        w = jax.random.normal(next(keys), (fan_in, fan_out), jnp.float32) / np.sqrt(fan_in)
        b = 0.1 * jax.random.normal(next(keys), (1, fan_out), jnp.float32)
        return w, b

    w_in, b_in = lin(input_dim, hidden_dim)
    w_mu, b_mu = lin(hidden_dim, latent_dim)
    w_lv, b_lv = lin(hidden_dim, latent_dim)

    R = jnp.asarray(_rot2_matrix(hs))

    def cat_heads(w):                # (H, hidden, d) -> (hidden, H*d), head-major columns
        return jnp.transpose(w, (1, 0, 2)).reshape(w.shape[1], w.shape[0] * w.shape[2])

    layer_params = []
    for _ in range(layers):
        wq = jax.random.normal(next(keys), (heads, hidden_dim, hs), jnp.float32) / hidden_dim
        wk = jax.random.normal(next(keys), (heads, hidden_dim, hs), jnp.float32) / hidden_dim
        wv = jax.random.normal(next(keys), (heads, hidden_dim, hv), jnp.float32) / hidden_dim
        wg = jax.random.normal(next(keys), (hidden_dim, v_dim), jnp.float32) / hidden_dim
        wo = jax.random.normal(next(keys), (v_dim, hidden_dim), jnp.float32) / hidden_dim
        w1, b1 = lin(hidden_dim, ffn_size)
        w2, b2 = lin(ffn_size, hidden_dim)

        # One concatenated projection block: [Wq | Wq@R | Wk | Wk@R | Wv] for all heads.
        # Folding rotate_every_two into extra weight columns makes the xpos rotation part
        # of a single lane-dense MXU matmul (exact: R is a signed permutation).
        wqkv = jnp.concatenate(
            [cat_heads(wq), cat_heads(jnp.matmul(wq, R)),
             cat_heads(wk), cat_heads(jnp.matmul(wk, R)),
             cat_heads(wv)], axis=1).astype(jnp.bfloat16)

        layer_params.append(dict(
            wqkv=wqkv,
            w_g=wg.astype(jnp.bfloat16),
            w_o=wo.reshape(heads, hv, hidden_dim).astype(jnp.bfloat16),   # per-head slabs
            gn_w=jnp.ones((heads, 1, hv), jnp.float32),
            gn_b=jnp.zeros((heads, 1, hv), jnp.float32),
            ln1_w=jnp.ones((1, hidden_dim), jnp.float32),
            ln1_b=jnp.zeros((1, hidden_dim), jnp.float32),
            ln2_w=jnp.ones((1, hidden_dim), jnp.float32),
            ln2_b=jnp.zeros((1, hidden_dim), jnp.float32),
            ffn_w1=w1.astype(jnp.bfloat16), ffn_b1=b1,
            ffn_w2=w2.astype(jnp.bfloat16), ffn_b2=b2,
        ))

    return dict(
        w_in=w_in.astype(jnp.bfloat16), b_in=b_in,
        norm_w=jnp.ones((1, hidden_dim), jnp.float32),
        norm_b=jnp.zeros((1, hidden_dim), jnp.float32),
        # concatenated [mu | logvar] head -> one deeper matmul + one lane-dense store
        w_head=jnp.concatenate([w_mu, w_lv], axis=1).astype(jnp.bfloat16),
        b_head=jnp.concatenate([b_mu, b_lv], axis=1),
        layers=layer_params,
    )


def make_retention_consts(seq_len, heads, head_size, scale_base=512.0):
    # per-head decay: gamma_h = 1 - exp(linspace(log(1/32), log(1/512), heads))
    gammas = 1.0 - np.exp(np.linspace(np.log(1.0 / 32), np.log(1.0 / 512), heads))
    log_gammas = np.log(gammas).astype(np.float32).reshape(heads, 1, 1)

    # xpos tables (scale folded into sin/cos; K uses 1/scale); identical for every head,
    # so tile them to (S, heads*head_size) -> one lane-dense multiply covers all heads.
    half = head_size // 2
    scale_vec = (np.arange(0, head_size, 2) + 0.4 * head_size) / (1.4 * head_size)
    pos = np.arange(seq_len, dtype=np.float64)[:, None]
    scale = scale_vec[None, :] ** (pos / scale_base)                 # (S, half)
    inv_freq = 1.0 / (10000.0 ** (np.arange(half) / half))
    sinus = pos * inv_freq[None, :]
    sin, cos = np.sin(sinus), np.cos(sinus)
    dup = lambda t: np.repeat(t, 2, axis=1).astype(np.float32)       # duplicate_interleave
    tile_h = lambda t: np.tile(t, (1, heads))

    return dict(
        cos_q=jnp.asarray(tile_h(dup(cos * scale))),
        sin_q=jnp.asarray(tile_h(dup(sin * scale))),
        cos_k=jnp.asarray(tile_h(dup(cos / scale))),
        sin_k=jnp.asarray(tile_h(dup(sin / scale))),
        log_gammas=jnp.asarray(log_gammas))


# ----------------------------------------------------------------------------
if __name__ == "__main__":
    B, S = 2, 8
    input_dim, latent_dim = 16, 8
    hidden_dim, layers, ffn_size, heads = 32, 1, 64, 2

    key = jax.random.PRNGKey(0)
    kx, kp = jax.random.split(key)
    x = jax.random.normal(kx, (B, S, input_dim), jnp.float32)

    params = init_params(kp, input_dim, latent_dim, hidden_dim, layers, ffn_size, heads)
    consts = make_retention_consts(S, heads, hidden_dim // heads)

    fwd = jax.jit(retnet_encoder_forward)
    mu, std = fwd(x, params, consts)
    jax.block_until_ready((mu, std))

    assert mu.shape == (B, S, latent_dim) and std.shape == (B, S, latent_dim)
    assert bool(jnp.all(std > 0.0))
    assert bool(jnp.all(jnp.isfinite(mu))) and bool(jnp.all(jnp.isfinite(std)))
    print("KERNEL_OK")
</pallas_src>

<mosaic_0001>
module attributes {stable_mosaic.version = 11 : i64} {
  func.func @input_proj_kernel(%arg0: i32, %arg1: memref<16x16xf32, #tpu.memory_space<vmem>>, %arg2: memref<16x32xbf16, #tpu.memory_space<vmem>>, %arg3: memref<1x32xf32, #tpu.memory_space<vmem>>, %arg4: memref<16x32xbf16, #tpu.memory_space<vmem>>) attributes {dimension_semantics = [#tpu.dimension_semantics<parallel>], iteration_bounds = array<i64: 1>, scalar_prefetch = 0 : i64, scratch_operands = 0 : i64, tpu.core_type = #tpu.core_type<tc>, window_params = [{transform_indices = @transform_0, window_bounds = array<i64: 16, 16>}, {pipeline_mode = #tpu.pipeline_mode<synchronous>, transform_indices = @transform_1, window_bounds = array<i64: 16, 32>}, {pipeline_mode = #tpu.pipeline_mode<synchronous>, transform_indices = @transform_2, window_bounds = array<i64: 1, 32>}, {transform_indices = @transform_3, window_bounds = array<i64: 16, 32>}]} {
    %c0 = arith.constant 0 : index
    %c0_0 = arith.constant 0 : index
    %0 = vector.load %arg1[%c0, %c0_0] : memref<16x16xf32, #tpu.memory_space<vmem>>, vector<16x16xf32>
    %1 = arith.truncf %0 : vector<16x16xf32> to vector<16x16xbf16>
    %c0_1 = arith.constant 0 : index
    %c0_2 = arith.constant 0 : index
    %2 = vector.load %arg2[%c0_1, %c0_2] : memref<16x32xbf16, #tpu.memory_space<vmem>>, vector<16x32xbf16>
    %cst = arith.constant dense<0.000000e+00> : vector<16x32xf32>
    %3 = tpu.matmul %1, %2, %cst {dimension_numbers = #tpu.dot_dimension_numbers<[1], [0], [0], [1], [0, 0, 1, 1], [], []>} : vector<16x16xbf16>, vector<16x32xbf16>, vector<16x32xf32> -> vector<16x32xf32>
    %c0_3 = arith.constant 0 : index
    %c0_4 = arith.constant 0 : index
    %4 = vector.load %arg3[%c0_3, %c0_4] : memref<1x32xf32, #tpu.memory_space<vmem>>, vector<1x32xf32>
    %5 = vector.broadcast %4 : vector<1x32xf32> to vector<16x32xf32>
    %6 = arith.addf %3, %5 : vector<16x32xf32>
    %7 = arith.truncf %6 : vector<16x32xf32> to vector<16x32xbf16>
    %c0_5 = arith.constant 0 : index
    %c0_6 = arith.constant 0 : index
    %8 = vector.load %arg4[%c0_5, %c0_6] : memref<16x32xbf16, #tpu.memory_space<vmem>>, vector<16x32xbf16>
    tpu.vector_store %arg4[%c0_5, %c0_6], %7 {strides = array<i32>} : memref<16x32xbf16, #tpu.memory_space<vmem>>, vector<16x32xbf16>,
    return
  }
  func.func @transform_0(%arg0: i32) -> (i32, i32) {
    %c0_i32 = arith.constant 0 : i32
    %c0_i32_0 = arith.constant 0 : i32
    return %arg0, %c0_i32 : i32, i32
  }
  func.func @transform_1(%arg0: i32) -> (i32, i32) {
    %c0_i32 = arith.constant 0 : i32
    %c0_i32_0 = arith.constant 0 : i32
    %c0_i32_1 = arith.constant 0 : i32
    return %c0_i32, %c0_i32_0 : i32, i32
  }
  func.func @transform_2(%arg0: i32) -> (i32, i32) {
    %c0_i32 = arith.constant 0 : i32
    %c0_i32_0 = arith.constant 0 : i32
    %c0_i32_1 = arith.constant 0 : i32
    return %c0_i32, %c0_i32_0 : i32, i32
  }
  func.func @transform_3(%arg0: i32) -> (i32, i32) {
    %c0_i32 = arith.constant 0 : i32
    %c0_i32_0 = arith.constant 0 : i32
    return %arg0, %c0_i32 : i32, i32
  }
}

module attributes {stable_mosaic.version = 11 : i64} {
  func.func @retention_core_kernel(%arg0: i32, %arg1: i32, %arg2: i32, %arg3: i32, %arg4: memref<1x8x32xbf16, #tpu.memory_space<vmem>>, %arg5: memref<1x1x8x16xbf16, #tpu.memory_space<vmem>>, %arg6: memref<1x1x8x16xbf16, #tpu.memory_space<vmem>>, %arg7: memref<1x1x8x16xbf16, #tpu.memory_space<vmem>>, %arg8: memref<1x1x8x16xbf16, #tpu.memory_space<vmem>>, %arg9: memref<1x1x1xf32, #tpu.memory_space<vmem>>, %arg10: memref<1x1x16xf32, #tpu.memory_space<vmem>>, %arg11: memref<1x1x16xf32, #tpu.memory_space<vmem>>, %arg12: memref<1x16x32xbf16, #tpu.memory_space<vmem>>, %arg13: memref<1x8x32xbf16, #tpu.memory_space<vmem>>, %arg14: memref<8x16xf32, #tpu.memory_space<vmem>>, %arg15: memref<8x32xf32, #tpu.memory_space<vmem>>) attributes {dimension_semantics = [#tpu.dimension_semantics<parallel>, #tpu.dimension_semantics<parallel>, #tpu.dimension_semantics<arbitrary>, #tpu.dimension_semantics<arbitrary>], iteration_bounds = array<i64: 2, 1, 2, 1>, scalar_prefetch = 0 : i64, scratch_operands = 2 : i64, tpu.core_type = #tpu.core_type<tc>, window_params = [{transform_indices = @transform_0, window_bounds = array<i64: 1, 8, 32>}, {transform_indices = @transform_1, window_bounds = array<i64: 1, 1, 8, 16>}, {transform_indices = @transform_2, window_bounds = array<i64: 1, 1, 8, 16>}, {transform_indices = @transform_3, window_bounds = array<i64: 1, 1, 8, 16>}, {transform_indices = @transform_4, window_bounds = array<i64: 1, 1, 8, 16>}, {transform_indices = @transform_5, window_bounds = array<i64: 1, 1, 1>}, {transform_indices = @transform_6, window_bounds = array<i64: 1, 1, 16>}, {transform_indices = @transform_7, window_bounds = array<i64: 1, 1, 16>}, {transform_indices = @transform_8, window_bounds = array<i64: 1, 16, 32>}, {transform_indices = @transform_9, window_bounds = array<i64: 1, 8, 32>}]} {
    %c0_i32 = arith.constant 0 : i32
    %0 = arith.cmpi eq, %arg3, %c0_i32 : i32
    %1 = arith.extui %0 : i1 to i32
    %c0_i32_0 = arith.constant 0 : i32
    %2 = arith.cmpi ne, %1, %c0_i32_0 : i32
    scf.if %2 {
      %cst = arith.constant 0.000000e+00 : f32
      %9 = vector.broadcast %cst : f32 to vector<8x16xf32>
      %c0 = arith.constant 0 : index
      %c0_4 = arith.constant 0 : index
      %10 = vector.load %arg14[%c0, %c0_4] : memref<8x16xf32, #tpu.memory_space<vmem>>, vector<8x16xf32>
      tpu.vector_store %arg14[%c0, %c0_4], %9 {strides = array<i32>} : memref<8x16xf32, #tpu.memory_space<vmem>>, vector<8x16xf32>,
    } else {
    }
    %3 = arith.cmpi sle, %arg3, %arg1 : i32
    %4 = arith.extui %3 : i1 to i32
    %c0_i32_1 = arith.constant 0 : i32
    %5 = arith.cmpi ne, %4, %c0_i32_1 : i32
    scf.if %5 {
      %c0 = arith.constant 0 : index
      %c0_4 = arith.constant 0 : index
      %c0_5 = arith.constant 0 : index
      %9 = vector.load %arg9[%c0, %c0_4, %c0_5] : memref<1x1x1xf32, #tpu.memory_space<vmem>>, vector<1x1x1xf32>
      %10 = vector.shape_cast %9 : vector<1x1x1xf32> to vector<1x1xf32>
      %11 = tpu.iota {dimensions = array<i32: 0>} : vector<8x1xi32>
      %12 = tpu.iota {dimensions = array<i32: 1>} : vector<1x8xi32>
      %13 = arith.subi %arg1, %arg3 : i32
      %c8_i32 = arith.constant 8 : i32
      %14 = arith.muli %13, %c8_i32 : i32
      %15 = vector.broadcast %14 : i32 to vector<8x1xi32>
      %16 = arith.addi %15, %11 : vector<8x1xi32>
      %17 = arith.sitofp %16 : vector<8x1xi32> to vector<8x1xf32>
      %18 = vector.broadcast %10 : vector<1x1xf32> to vector<8x1xf32>
      %19 = arith.mulf %17, %18 : vector<8x1xf32>
      %20 = math.exp %19 : vector<8x1xf32>
      %21 = arith.sitofp %12 : vector<1x8xi32> to vector<1x8xf32>
      %cst = arith.constant 0.000000e+00 : f32
      %22 = vector.broadcast %cst : f32 to vector<1x1xf32>
      %23 = arith.subf %22, %10 : vector<1x1xf32>
      %24 = vector.broadcast %23 : vector<1x1xf32> to vector<1x8xf32>
      %25 = arith.mulf %21, %24 : vector<1x8xf32>
      %26 = math.exp %25 : vector<1x8xf32>
      %27 = vector.broadcast %16 : vector<8x1xi32> to vector<8x8xi32>
      %28 = vector.broadcast %12 : vector<1x8xi32> to vector<8x8xi32>
      %29 = arith.cmpi sge, %27, %28 : vector<8x8xi32>
      %30 = vector.broadcast %20 : vector<8x1xf32> to vector<8x8xf32>
      %31 = vector.broadcast %26 : vector<1x8xf32> to vector<8x8xf32>
      %32 = arith.mulf %30, %31 : vector<8x8xf32>
      %cst_6 = arith.constant 0.000000e+00 : f32
      %33 = vector.broadcast %cst_6 : f32 to vector<8x8xf32>
      %34 = arith.select %29, %32, %33 : vector<8x8xi1>, vector<8x8xf32>
      %c0_7 = arith.constant 0 : index
      %c0_8 = arith.constant 0 : index
      %c0_9 = arith.constant 0 : index
      %c0_10 = arith.constant 0 : index
      %35 = vector.load %arg5[%c0_7, %c0_8, %c0_9, %c0_10] : memref<1x1x8x16xbf16, #tpu.memory_space<vmem>>, vector<1x1x8x16xbf16>
      %36 = vector.shape_cast %35 : vector<1x1x8x16xbf16> to vector<8x16xbf16>
      %c0_11 = arith.constant 0 : index
      %c0_12 = arith.constant 0 : index
      %c0_13 = arith.constant 0 : index
      %c0_14 = arith.constant 0 : index
      %37 = vector.load %arg6[%c0_11, %c0_12, %c0_13, %c0_14] : memref<1x1x8x16xbf16, #tpu.memory_space<vmem>>, vector<1x1x8x16xbf16>
      %38 = vector.shape_cast %37 : vector<1x1x8x16xbf16> to vector<8x16xbf16>
      %cst_15 = arith.constant dense<0.000000e+00> : vector<8x8xf32>
      %39 = tpu.matmul %36, %38, %cst_15 {dimension_numbers = #tpu.dot_dimension_numbers<[1], [1], [0], [0], [0, 0, 1, 0], [], []>} : vector<8x16xbf16>, vector<8x16xbf16>, vector<8x8xf32> -> vector<8x8xf32>
      %40 = arith.mulf %39, %34 : vector<8x8xf32>
      %c0_16 = arith.constant 0 : index
      %c0_17 = arith.constant 0 : index
      %41 = vector.load %arg14[%c0_16, %c0_17] : memref<8x16xf32, #tpu.memory_space<vmem>>, vector<8x16xf32>
      %42 = arith.truncf %40 : vector<8x8xf32> to vector<8x8xbf16>
      %c0_18 = arith.constant 0 : index
      %c0_19 = arith.constant 0 : index
      %c0_20 = arith.constant 0 : index
      %c0_21 = arith.constant 0 : index
      %43 = vector.load %arg7[%c0_18, %c0_19, %c0_20, %c0_21] : memref<1x1x8x16xbf16, #tpu.memory_space<vmem>>, vector<1x1x8x16xbf16>
      %44 = vector.shape_cast %43 : vector<1x1x8x16xbf16> to vector<8x16xbf16>
      %cst_22 = arith.constant dense<0.000000e+00> : vector<8x16xf32>
      %45 = tpu.matmul %42, %44, %cst_22 {dimension_numbers = #tpu.dot_dimension_numbers<[1], [0], [0], [1], [0, 0, 1, 1], [], []>} : vector<8x8xbf16>, vector<8x16xbf16>, vector<8x16xf32> -> vector<8x16xf32>
      %46 = arith.addf %41, %45 : vector<8x16xf32>
      %c0_23 = arith.constant 0 : index
      %c0_24 = arith.constant 0 : index
      %47 = vector.load %arg14[%c0_23, %c0_24] : memref<8x16xf32, #tpu.memory_space<vmem>>, vector<8x16xf32>
      tpu.vector_store %arg14[%c0_23, %c0_24], %46 {strides = array<i32>} : memref<8x16xf32, #tpu.memory_space<vmem>>, vector<8x16xf32>,
    } else {
    }
    %c0_i32_2 = arith.constant 0 : i32
    %6 = arith.cmpi eq, %arg3, %c0_i32_2 : i32
    %7 = arith.extui %6 : i1 to i32
    %c0_i32_3 = arith.constant 0 : i32
    %8 = arith.cmpi ne, %7, %c0_i32_3 : i32
    scf.if %8 {
      %c0 = arith.constant 0 : index
      %c0_4 = arith.constant 0 : index
      %9 = vector.load %arg14[%c0, %c0_4] : memref<8x16xf32, #tpu.memory_space<vmem>>, vector<8x16xf32>
      %cst = arith.constant dense<0.000000e+00> : vector<8xf32>
      %10 = vector.multi_reduction <add>, %9, %cst [1] : vector<8x16xf32> to vector<8xf32>
      %11 = vector.shape_cast %10 : vector<8xf32> to vector<8x1xf32>
      %cst_5 = arith.constant 1.600000e+01 : f32
      %12 = vector.broadcast %cst_5 : f32 to vector<8x1xf32>
      %13 = arith.divf %11, %12 : vector<8x1xf32>
      %14 = vector.broadcast %13 : vector<8x1xf32> to vector<8x16xf32>
      %15 = arith.subf %9, %14 : vector<8x16xf32>
      %16 = arith.mulf %15, %15 : vector<8x16xf32>
      %cst_6 = arith.constant dense<0.000000e+00> : vector<8xf32>
      %17 = vector.multi_reduction <add>, %16, %cst_6 [1] : vector<8x16xf32> to vector<8xf32>
      %18 = vector.shape_cast %17 : vector<8xf32> to vector<8x1xf32>
      %cst_7 = arith.constant 1.600000e+01 : f32
      %19 = vector.broadcast %cst_7 : f32 to vector<8x1xf32>
      %20 = arith.divf %18, %19 : vector<8x1xf32>
      %21 = vector.broadcast %13 : vector<8x1xf32> to vector<8x16xf32>
      %22 = arith.subf %9, %21 : vector<8x16xf32>
      %cst_8 = arith.constant 9.99999974E-6 : f32
      %23 = vector.broadcast %cst_8 : f32 to vector<8x1xf32>
      %24 = arith.addf %20, %23 : vector<8x1xf32>
      %25 = math.rsqrt %24 : vector<8x1xf32>
      %26 = vector.broadcast %25 : vector<8x1xf32> to vector<8x16xf32>
      %27 = arith.mulf %22, %26 : vector<8x16xf32>
      %c0_9 = arith.constant 0 : index
      %c0_10 = arith.constant 0 : index
      %c0_11 = arith.constant 0 : index
      %28 = vector.load %arg10[%c0_9, %c0_10, %c0_11] : memref<1x1x16xf32, #tpu.memory_space<vmem>>, vector<1x1x16xf32>
      %29 = vector.shape_cast %28 : vector<1x1x16xf32> to vector<1x16xf32>
      %30 = vector.broadcast %29 : vector<1x16xf32> to vector<8x16xf32>
      %31 = arith.mulf %27, %30 : vector<8x16xf32>
      %c0_12 = arith.constant 0 : index
      %c0_13 = arith.constant 0 : index
      %c0_14 = arith.constant 0 : index
      %32 = vector.load %arg11[%c0_12, %c0_13, %c0_14] : memref<1x1x16xf32, #tpu.memory_space<vmem>>, vector<1x1x16xf32>
      %33 = vector.shape_cast %32 : vector<1x1x16xf32> to vector<1x16xf32>
      %34 = vector.broadcast %33 : vector<1x16xf32> to vector<8x16xf32>
      %35 = arith.addf %31, %34 : vector<8x16xf32>
      %c0_15 = arith.constant 0 : index
      %c0_16 = arith.constant 0 : index
      %c0_17 = arith.constant 0 : index
      %c0_18 = arith.constant 0 : index
      %36 = vector.load %arg8[%c0_15, %c0_16, %c0_17, %c0_18] : memref<1x1x8x16xbf16, #tpu.memory_space<vmem>>, vector<1x1x8x16xbf16>
      %37 = vector.shape_cast %36 : vector<1x1x8x16xbf16> to vector<8x16xbf16>
      %38 = arith.extf %37 : vector<8x16xbf16> to vector<8x16xf32>
      %39 = arith.mulf %35, %38 : vector<8x16xf32>
      %40 = arith.truncf %39 : vector<8x16xf32> to vector<8x16xbf16>
      %c0_19 = arith.constant 0 : index
      %c0_20 = arith.constant 0 : index
      %c0_21 = arith.constant 0 : index
      %41 = vector.load %arg12[%c0_19, %c0_20, %c0_21] : memref<1x16x32xbf16, #tpu.memory_space<vmem>>, vector<1x16x32xbf16>
      %42 = vector.shape_cast %41 : vector<1x16x32xbf16> to vector<16x32xbf16>
      %cst_22 = arith.constant dense<0.000000e+00> : vector<8x32xf32>
      %43 = tpu.matmul %40, %42, %cst_22 {dimension_numbers = #tpu.dot_dimension_numbers<[1], [0], [0], [1], [0, 0, 1, 1], [], []>} : vector<8x16xbf16>, vector<16x32xbf16>, vector<8x32xf32> -> vector<8x32xf32>
      %c0_i32_23 = arith.constant 0 : i32
      %44 = arith.cmpi eq, %arg2, %c0_i32_23 : i32
      %45 = arith.extui %44 : i1 to i32
      %c0_i32_24 = arith.constant 0 : i32
      %46 = arith.cmpi ne, %45, %c0_i32_24 : i32
      scf.if %46 {
        %c0_30 = arith.constant 0 : index
        %c0_31 = arith.constant 0 : index
        %c0_32 = arith.constant 0 : index
        %53 = vector.load %arg4[%c0_30, %c0_31, %c0_32] : memref<1x8x32xbf16, #tpu.memory_space<vmem>>, vector<1x8x32xbf16>
        %54 = vector.shape_cast %53 : vector<1x8x32xbf16> to vector<8x32xbf16>
        %55 = arith.extf %54 : vector<8x32xbf16> to vector<8x32xf32>
        %c0_33 = arith.constant 0 : index
        %c0_34 = arith.constant 0 : index
        %56 = vector.load %arg15[%c0_33, %c0_34] : memref<8x32xf32, #tpu.memory_space<vmem>>, vector<8x32xf32>
        tpu.vector_store %arg15[%c0_33, %c0_34], %55 {strides = array<i32>} : memref<8x32xf32, #tpu.memory_space<vmem>>, vector<8x32xf32>,
      } else {
      }
      %c0_25 = arith.constant 0 : index
      %c0_26 = arith.constant 0 : index
      %47 = vector.load %arg15[%c0_25, %c0_26] : memref<8x32xf32, #tpu.memory_space<vmem>>, vector<8x32xf32>
      %48 = arith.addf %47, %43 : vector<8x32xf32>
      %c0_27 = arith.constant 0 : index
      %c0_28 = arith.constant 0 : index
      %49 = vector.load %arg15[%c0_27, %c0_28] : memref<8x32xf32, #tpu.memory_space<vmem>>, vector<8x32xf32>
      tpu.vector_store %arg15[%c0_27, %c0_28], %48 {strides = array<i32>} : memref<8x32xf32, #tpu.memory_space<vmem>>, vector<8x32xf32>,
      %c1_i32 = arith.constant 1 : i32
      %50 = arith.cmpi eq, %arg2, %c1_i32 : i32
      %51 = arith.extui %50 : i1 to i32
      %c0_i32_29 = arith.constant 0 : i32
      %52 = arith.cmpi ne, %51, %c0_i32_29 : i32
      scf.if %52 {
        %c0_30 = arith.constant 0 : index
        %c0_31 = arith.constant 0 : index
        %53 = vector.load %arg15[%c0_30, %c0_31] : memref<8x32xf32, #tpu.memory_space<vmem>>, vector<8x32xf32>
        %54 = arith.truncf %53 : vector<8x32xf32> to vector<8x32xbf16>
        %c0_32 = arith.constant 0 : index
        %c0_33 = arith.constant 0 : index
        %c0_34 = arith.constant 0 : index
        %55 = vector.load %arg13[%c0_32, %c0_33, %c0_34] : memref<1x8x32xbf16, #tpu.memory_space<vmem>>, vector<1x8x32xbf16>
        %56 = vector.shape_cast %55 : vector<1x8x32xbf16> to vector<8x32xbf16>
        %57 = vector.shape_cast %54 : vector<8x32xbf16> to vector<1x8x32xbf16>
        tpu.vector_store %arg13[%c0_32, %c0_33, %c0_34], %57 {strides = array<i32>} : memref<1x8x32xbf16, #tpu.memory_space<vmem>>, vector<1x8x32xbf16>,
      } else {
      }
    } else {
    }
    return
  }
  func.func @transform_0(%arg0: i32, %arg1: i32, %arg2: i32, %arg3: i32) -> (i32, i32, i32) {
    %c0_i32 = arith.constant 0 : i32
    %c0_i32_0 = arith.constant 0 : i32
    return %arg0, %arg1, %c0_i32 : i32, i32, i32
  }
  func.func @transform_1(%arg0: i32, %arg1: i32, %arg2: i32, %arg3: i32) -> (i32, i32, i32, i32) {
    %c0_i32 = arith.constant 0 : i32
    %c0_i32_0 = arith.constant 0 : i32
    return %arg0, %arg2, %arg1, %c0_i32 : i32, i32, i32, i32
  }
  func.func @transform_2(%arg0: i32, %arg1: i32, %arg2: i32, %arg3: i32) -> (i32, i32, i32, i32) {
    %0 = arith.minsi %arg3, %arg1 : i32
    %c0_i32 = arith.constant 0 : i32
    %c0_i32_0 = arith.constant 0 : i32
    return %arg0, %arg2, %0, %c0_i32 : i32, i32, i32, i32
  }
  func.func @transform_3(%arg0: i32, %arg1: i32, %arg2: i32, %arg3: i32) -> (i32, i32, i32, i32) {
    %0 = arith.minsi %arg3, %arg1 : i32
    %c0_i32 = arith.constant 0 : i32
    %c0_i32_0 = arith.constant 0 : i32
    return %arg0, %arg2, %0, %c0_i32 : i32, i32, i32, i32
  }
  func.func @transform_4(%arg0: i32, %arg1: i32, %arg2: i32, %arg3: i32) -> (i32, i32, i32, i32) {
    %c0_i32 = arith.constant 0 : i32
    %c0_i32_0 = arith.constant 0 : i32
    return %arg0, %arg2, %arg1, %c0_i32 : i32, i32, i32, i32
  }
  func.func @transform_5(%arg0: i32, %arg1: i32, %arg2: i32, %arg3: i32) -> (i32, i32, i32) {
    %c0_i32 = arith.constant 0 : i32
    %c0_i32_0 = arith.constant 0 : i32
    %c0_i32_1 = arith.constant 0 : i32
    return %arg2, %c0_i32, %c0_i32_0 : i32, i32, i32
  }
  func.func @transform_6(%arg0: i32, %arg1: i32, %arg2: i32, %arg3: i32) -> (i32, i32, i32) {
    %c0_i32 = arith.constant 0 : i32
    %c0_i32_0 = arith.constant 0 : i32
    %c0_i32_1 = arith.constant 0 : i32
    return %arg2, %c0_i32, %c0_i32_0 : i32, i32, i32
  }
  func.func @transform_7(%arg0: i32, %arg1: i32, %arg2: i32, %arg3: i32) -> (i32, i32, i32) {
    %c0_i32 = arith.constant 0 : i32
    %c0_i32_0 = arith.constant 0 : i32
    %c0_i32_1 = arith.constant 0 : i32
    return %arg2, %c0_i32, %c0_i32_0 : i32, i32, i32
  }
  func.func @transform_8(%arg0: i32, %arg1: i32, %arg2: i32, %arg3: i32) -> (i32, i32, i32) {
    %c0_i32 = arith.constant 0 : i32
    %c0_i32_0 = arith.constant 0 : i32
    %c0_i32_1 = arith.constant 0 : i32
    return %arg2, %c0_i32, %c0_i32_0 : i32, i32, i32
  }
  func.func @transform_9(%arg0: i32, %arg1: i32, %arg2: i32, %arg3: i32) -> (i32, i32, i32) {
    %c0_i32 = arith.constant 0 : i32
    %c0_i32_0 = arith.constant 0 : i32
    return %arg0, %arg1, %c0_i32 : i32, i32, i32
  }
}

module attributes {stable_mosaic.version = 11 : i64} {
  func.func @qkv_gate_kernel(%arg0: i32, %arg1: i32, %arg2: memref<1x8x32xbf16, #tpu.memory_space<vmem>>, %arg3: memref<1x32xf32, #tpu.memory_space<vmem>>, %arg4: memref<1x32xf32, #tpu.memory_space<vmem>>, %arg5: memref<32x160xbf16, #tpu.memory_space<vmem>>, %arg6: memref<32x32xbf16, #tpu.memory_space<vmem>>, %arg7: memref<8x32xf32, #tpu.memory_space<vmem>>, %arg8: memref<8x32xf32, #tpu.memory_space<vmem>>, %arg9: memref<8x32xf32, #tpu.memory_space<vmem>>, %arg10: memref<8x32xf32, #tpu.memory_space<vmem>>, %arg11: memref<1x2x8x16xbf16, #tpu.memory_space<vmem>>, %arg12: memref<1x2x8x16xbf16, #tpu.memory_space<vmem>>, %arg13: memref<1x2x8x16xbf16, #tpu.memory_space<vmem>>, %arg14: memref<1x2x8x16xbf16, #tpu.memory_space<vmem>>) attributes {dimension_semantics = [#tpu.dimension_semantics<parallel>, #tpu.dimension_semantics<parallel>], iteration_bounds = array<i64: 2, 1>, scalar_prefetch = 0 : i64, scratch_operands = 0 : i64, tpu.core_type = #tpu.core_type<tc>, window_params = [{transform_indices = @transform_0, window_bounds = array<i64: 1, 8, 32>}, {pipeline_mode = #tpu.pipeline_mode<synchronous>, transform_indices = @transform_1, window_bounds = array<i64: 1, 32>}, {pipeline_mode = #tpu.pipeline_mode<synchronous>, transform_indices = @transform_2, window_bounds = array<i64: 1, 32>}, {pipeline_mode = #tpu.pipeline_mode<synchronous>, transform_indices = @transform_3, window_bounds = array<i64: 32, 160>}, {pipeline_mode = #tpu.pipeline_mode<synchronous>, transform_indices = @transform_4, window_bounds = array<i64: 32, 32>}, {transform_indices = @transform_5, window_bounds = array<i64: 8, 32>}, {transform_indices = @transform_6, window_bounds = array<i64: 8, 32>}, {transform_indices = @transform_7, window_bounds = array<i64: 8, 32>}, {transform_indices = @transform_8, window_bounds = array<i64: 8, 32>}, {transform_indices = @transform_9, window_bounds = array<i64: 1, 2, 8, 16>}, {transform_indices = @transform_10, window_bounds = array<i64: 1, 2, 8, 16>}, {transform_indices = @transform_11, window_bounds = array<i64: 1, 2, 8, 16>}, {transform_indices = @transform_12, window_bounds = array<i64: 1, 2, 8, 16>}]} {
    %c0 = arith.constant 0 : index
    %c0_0 = arith.constant 0 : index
    %c0_1 = arith.constant 0 : index
    %0 = vector.load %arg2[%c0, %c0_0, %c0_1] : memref<1x8x32xbf16, #tpu.memory_space<vmem>>, vector<1x8x32xbf16>
    %1 = vector.shape_cast %0 : vector<1x8x32xbf16> to vector<8x32xbf16>
    %2 = arith.extf %1 : vector<8x32xbf16> to vector<8x32xf32>
    %cst = arith.constant dense<0.000000e+00> : vector<8xf32>
    %3 = vector.multi_reduction <add>, %2, %cst [1] : vector<8x32xf32> to vector<8xf32>
    %4 = vector.shape_cast %3 : vector<8xf32> to vector<8x1xf32>
    %cst_2 = arith.constant 3.200000e+01 : f32
    %5 = vector.broadcast %cst_2 : f32 to vector<8x1xf32>
    %6 = arith.divf %4, %5 : vector<8x1xf32>
    %7 = vector.broadcast %6 : vector<8x1xf32> to vector<8x32xf32>
    %8 = arith.subf %2, %7 : vector<8x32xf32>
    %9 = arith.mulf %8, %8 : vector<8x32xf32>
    %cst_3 = arith.constant dense<0.000000e+00> : vector<8xf32>
    %10 = vector.multi_reduction <add>, %9, %cst_3 [1] : vector<8x32xf32> to vector<8xf32>
    %11 = vector.shape_cast %10 : vector<8xf32> to vector<8x1xf32>
    %cst_4 = arith.constant 3.200000e+01 : f32
    %12 = vector.broadcast %cst_4 : f32 to vector<8x1xf32>
    %13 = arith.divf %11, %12 : vector<8x1xf32>
    %14 = vector.broadcast %6 : vector<8x1xf32> to vector<8x32xf32>
    %15 = arith.subf %2, %14 : vector<8x32xf32>
    %cst_5 = arith.constant 9.99999974E-6 : f32
    %16 = vector.broadcast %cst_5 : f32 to vector<8x1xf32>
    %17 = arith.addf %13, %16 : vector<8x1xf32>
    %18 = math.rsqrt %17 : vector<8x1xf32>
    %19 = vector.broadcast %18 : vector<8x1xf32> to vector<8x32xf32>
    %20 = arith.mulf %15, %19 : vector<8x32xf32>
    %c0_6 = arith.constant 0 : index
    %c0_7 = arith.constant 0 : index
    %21 = vector.load %arg3[%c0_6, %c0_7] : memref<1x32xf32, #tpu.memory_space<vmem>>, vector<1x32xf32>
    %22 = vector.broadcast %21 : vector<1x32xf32> to vector<8x32xf32>
    %23 = arith.mulf %20, %22 : vector<8x32xf32>
    %c0_8 = arith.constant 0 : index
    %c0_9 = arith.constant 0 : index
    %24 = vector.load %arg4[%c0_8, %c0_9] : memref<1x32xf32, #tpu.memory_space<vmem>>, vector<1x32xf32>
    %25 = vector.broadcast %24 : vector<1x32xf32> to vector<8x32xf32>
    %26 = arith.addf %23, %25 : vector<8x32xf32>
    %27 = arith.truncf %26 : vector<8x32xf32> to vector<8x32xbf16>
    %c0_10 = arith.constant 0 : index
    %c0_11 = arith.constant 0 : index
    %28 = vector.load %arg5[%c0_10, %c0_11] : memref<32x160xbf16, #tpu.memory_space<vmem>>, vector<32x160xbf16>
    %cst_12 = arith.constant dense<0.000000e+00> : vector<8x160xf32>
    %29 = tpu.matmul %27, %28, %cst_12 {dimension_numbers = #tpu.dot_dimension_numbers<[1], [0], [0], [1], [0, 0, 1, 1], [], []>} : vector<8x32xbf16>, vector<32x160xbf16>, vector<8x160xf32> -> vector<8x160xf32>
    %30 = vector.extract_strided_slice %29 {offsets = [0, 0], sizes = [8, 32], strides = [1, 1]} : vector<8x160xf32> to vector<8x32xf32>
    %31 = vector.extract_strided_slice %29 {offsets = [0, 32], sizes = [8, 32], strides = [1, 1]} : vector<8x160xf32> to vector<8x32xf32>
    %32 = vector.extract_strided_slice %29 {offsets = [0, 64], sizes = [8, 32], strides = [1, 1]} : vector<8x160xf32> to vector<8x32xf32>
    %33 = vector.extract_strided_slice %29 {offsets = [0, 96], sizes = [8, 32], strides = [1, 1]} : vector<8x160xf32> to vector<8x32xf32>
    %34 = vector.extract_strided_slice %29 {offsets = [0, 128], sizes = [8, 32], strides = [1, 1]} : vector<8x160xf32> to vector<8x32xf32>
    %c0_13 = arith.constant 0 : index
    %c0_14 = arith.constant 0 : index
    %35 = vector.load %arg7[%c0_13, %c0_14] : memref<8x32xf32, #tpu.memory_space<vmem>>, vector<8x32xf32>
    %36 = arith.mulf %30, %35 : vector<8x32xf32>
    %c0_15 = arith.constant 0 : index
    %c0_16 = arith.constant 0 : index
    %37 = vector.load %arg8[%c0_15, %c0_16] : memref<8x32xf32, #tpu.memory_space<vmem>>, vector<8x32xf32>
    %38 = arith.mulf %31, %37 : vector<8x32xf32>
    %39 = arith.addf %36, %38 : vector<8x32xf32>
    %40 = arith.truncf %39 : vector<8x32xf32> to vector<8x32xbf16>
    %c0_17 = arith.constant 0 : index
    %c0_18 = arith.constant 0 : index
    %41 = vector.load %arg9[%c0_17, %c0_18] : memref<8x32xf32, #tpu.memory_space<vmem>>, vector<8x32xf32>
    %42 = arith.mulf %32, %41 : vector<8x32xf32>
    %c0_19 = arith.constant 0 : index
    %c0_20 = arith.constant 0 : index
    %43 = vector.load %arg10[%c0_19, %c0_20] : memref<8x32xf32, #tpu.memory_space<vmem>>, vector<8x32xf32>
    %44 = arith.mulf %33, %43 : vector<8x32xf32>
    %45 = arith.addf %42, %44 : vector<8x32xf32>
    %46 = arith.truncf %45 : vector<8x32xf32> to vector<8x32xbf16>
    %47 = arith.truncf %34 : vector<8x32xf32> to vector<8x32xbf16>
    %c0_21 = arith.constant 0 : index
    %c0_22 = arith.constant 0 : index
    %48 = vector.load %arg6[%c0_21, %c0_22] : memref<32x32xbf16, #tpu.memory_space<vmem>>, vector<32x32xbf16>
    %cst_23 = arith.constant dense<0.000000e+00> : vector<8x32xf32>
    %49 = tpu.matmul %27, %48, %cst_23 {dimension_numbers = #tpu.dot_dimension_numbers<[1], [0], [0], [1], [0, 0, 1, 1], [], []>} : vector<8x32xbf16>, vector<32x32xbf16>, vector<8x32xf32> -> vector<8x32xf32>
    %cst_24 = arith.constant 0.000000e+00 : f32
    %50 = vector.broadcast %cst_24 : f32 to vector<8x32xf32>
    %51 = arith.subf %50, %49 : vector<8x32xf32>
    %52 = math.exp %51 : vector<8x32xf32>
    %cst_25 = arith.constant 1.000000e+00 : f32
    %53 = vector.broadcast %cst_25 : f32 to vector<8x32xf32>
    %54 = arith.addf %53, %52 : vector<8x32xf32>
    %cst_26 = arith.constant 1.000000e+00 : f32
    %55 = vector.broadcast %cst_26 : f32 to vector<8x32xf32>
    %56 = arith.divf %55, %54 : vector<8x32xf32>
    %57 = arith.mulf %49, %56 : vector<8x32xf32>
    %58 = arith.truncf %57 : vector<8x32xf32> to vector<8x32xbf16>
    %59 = vector.extract_strided_slice %40 {offsets = [0, 0], sizes = [8, 16], strides = [1, 1]} : vector<8x32xbf16> to vector<8x16xbf16>
    %c0_27 = arith.constant 0 : index
    %c0_28 = arith.constant 0 : index
    %c0_29 = arith.constant 0 : index
    %c0_30 = arith.constant 0 : index
    %60 = vector.load %arg11[%c0_27, %c0_28, %c0_29, %c0_30] : memref<1x2x8x16xbf16, #tpu.memory_space<vmem>>, vector<1x1x8x16xbf16>
    %61 = vector.shape_cast %60 : vector<1x1x8x16xbf16> to vector<8x16xbf16>
    %62 = vector.shape_cast %59 : vector<8x16xbf16> to vector<1x1x8x16xbf16>
    tpu.vector_store %arg11[%c0_27, %c0_28, %c0_29, %c0_30], %62 {strides = array<i32>} : memref<1x2x8x16xbf16, #tpu.memory_space<vmem>>, vector<1x1x8x16xbf16>,
    %63 = vector.extract_strided_slice %46 {offsets = [0, 0], sizes = [8, 16], strides = [1, 1]} : vector<8x32xbf16> to vector<8x16xbf16>
    %c0_31 = arith.constant 0 : index
    %c0_32 = arith.constant 0 : index
    %c0_33 = arith.constant 0 : index
    %c0_34 = arith.constant 0 : index
    %64 = vector.load %arg12[%c0_31, %c0_32, %c0_33, %c0_34] : memref<1x2x8x16xbf16, #tpu.memory_space<vmem>>, vector<1x1x8x16xbf16>
    %65 = vector.shape_cast %64 : vector<1x1x8x16xbf16> to vector<8x16xbf16>
    %66 = vector.shape_cast %63 : vector<8x16xbf16> to vector<1x1x8x16xbf16>
    tpu.vector_store %arg12[%c0_31, %c0_32, %c0_33, %c0_34], %66 {strides = array<i32>} : memref<1x2x8x16xbf16, #tpu.memory_space<vmem>>, vector<1x1x8x16xbf16>,
    %67 = vector.extract_strided_slice %47 {offsets = [0, 0], sizes = [8, 16], strides = [1, 1]} : vector<8x32xbf16> to vector<8x16xbf16>
    %c0_35 = arith.constant 0 : index
    %c0_36 = arith.constant 0 : index
    %c0_37 = arith.constant 0 : index
    %c0_38 = arith.constant 0 : index
    %68 = vector.load %arg13[%c0_35, %c0_36, %c0_37, %c0_38] : memref<1x2x8x16xbf16, #tpu.memory_space<vmem>>, vector<1x1x8x16xbf16>
    %69 = vector.shape_cast %68 : vector<1x1x8x16xbf16> to vector<8x16xbf16>
    %70 = vector.shape_cast %67 : vector<8x16xbf16> to vector<1x1x8x16xbf16>
    tpu.vector_store %arg13[%c0_35, %c0_36, %c0_37, %c0_38], %70 {strides = array<i32>} : memref<1x2x8x16xbf16, #tpu.memory_space<vmem>>, vector<1x1x8x16xbf16>,
    %71 = vector.extract_strided_slice %58 {offsets = [0, 0], sizes = [8, 16], strides = [1, 1]} : vector<8x32xbf16> to vector<8x16xbf16>
    %c0_39 = arith.constant 0 : index
    %c0_40 = arith.constant 0 : index
    %c0_41 = arith.constant 0 : index
    %c0_42 = arith.constant 0 : index
    %72 = vector.load %arg14[%c0_39, %c0_40, %c0_41, %c0_42] : memref<1x2x8x16xbf16, #tpu.memory_space<vmem>>, vector<1x1x8x16xbf16>
    %73 = vector.shape_cast %72 : vector<1x1x8x16xbf16> to vector<8x16xbf16>
    %74 = vector.shape_cast %71 : vector<8x16xbf16> to vector<1x1x8x16xbf16>
    tpu.vector_store %arg14[%c0_39, %c0_40, %c0_41, %c0_42], %74 {strides = array<i32>} : memref<1x2x8x16xbf16, #tpu.memory_space<vmem>>, vector<1x1x8x16xbf16>,
    %75 = vector.extract_strided_slice %40 {offsets = [0, 16], sizes = [8, 16], strides = [1, 1]} : vector<8x32xbf16> to vector<8x16xbf16>
    %c0_43 = arith.constant 0 : index
    %c1 = arith.constant 1 : index
    %c0_44 = arith.constant 0 : index
    %c0_45 = arith.constant 0 : index
    %76 = vector.load %arg11[%c0_43, %c1, %c0_44, %c0_45] : memref<1x2x8x16xbf16, #tpu.memory_space<vmem>>, vector<1x1x8x16xbf16>
    %77 = vector.shape_cast %76 : vector<1x1x8x16xbf16> to vector<8x16xbf16>
    %78 = vector.shape_cast %75 : vector<8x16xbf16> to vector<1x1x8x16xbf16>
    tpu.vector_store %arg11[%c0_43, %c1, %c0_44, %c0_45], %78 {strides = array<i32>} : memref<1x2x8x16xbf16, #tpu.memory_space<vmem>>, vector<1x1x8x16xbf16>,
    %79 = vector.extract_strided_slice %46 {offsets = [0, 16], sizes = [8, 16], strides = [1, 1]} : vector<8x32xbf16> to vector<8x16xbf16>
    %c0_46 = arith.constant 0 : index
    %c1_47 = arith.constant 1 : index
    %c0_48 = arith.constant 0 : index
    %c0_49 = arith.constant 0 : index
    %80 = vector.load %arg12[%c0_46, %c1_47, %c0_48, %c0_49] : memref<1x2x8x16xbf16, #tpu.memory_space<vmem>>, vector<1x1x8x16xbf16>
    %81 = vector.shape_cast %80 : vector<1x1x8x16xbf16> to vector<8x16xbf16>
    %82 = vector.shape_cast %79 : vector<8x16xbf16> to vector<1x1x8x16xbf16>
    tpu.vector_store %arg12[%c0_46, %c1_47, %c0_48, %c0_49], %82 {strides = array<i32>} : memref<1x2x8x16xbf16, #tpu.memory_space<vmem>>, vector<1x1x8x16xbf16>,
    %83 = vector.extract_strided_slice %47 {offsets = [0, 16], sizes = [8, 16], strides = [1, 1]} : vector<8x32xbf16> to vector<8x16xbf16>
    %c0_50 = arith.constant 0 : index
    %c1_51 = arith.constant 1 : index
    %c0_52 = arith.constant 0 : index
    %c0_53 = arith.constant 0 : index
    %84 = vector.load %arg13[%c0_50, %c1_51, %c0_52, %c0_53] : memref<1x2x8x16xbf16, #tpu.memory_space<vmem>>, vector<1x1x8x16xbf16>
    %85 = vector.shape_cast %84 : vector<1x1x8x16xbf16> to vector<8x16xbf16>
    %86 = vector.shape_cast %83 : vector<8x16xbf16> to vector<1x1x8x16xbf16>
    tpu.vector_store %arg13[%c0_50, %c1_51, %c0_52, %c0_53], %86 {strides = array<i32>} : memref<1x2x8x16xbf16, #tpu.memory_space<vmem>>, vector<1x1x8x16xbf16>,
    %87 = vector.extract_strided_slice %58 {offsets = [0, 16], sizes = [8, 16], strides = [1, 1]} : vector<8x32xbf16> to vector<8x16xbf16>
    %c0_54 = arith.constant 0 : index
    %c1_55 = arith.constant 1 : index
    %c0_56 = arith.constant 0 : index
    %c0_57 = arith.constant 0 : index
    %88 = vector.load %arg14[%c0_54, %c1_55, %c0_56, %c0_57] : memref<1x2x8x16xbf16, #tpu.memory_space<vmem>>, vector<1x1x8x16xbf16>
    %89 = vector.shape_cast %88 : vector<1x1x8x16xbf16> to vector<8x16xbf16>
    %90 = vector.shape_cast %87 : vector<8x16xbf16> to vector<1x1x8x16xbf16>
    tpu.vector_store %arg14[%c0_54, %c1_55, %c0_56, %c0_57], %90 {strides = array<i32>} : memref<1x2x8x16xbf16, #tpu.memory_space<vmem>>, vector<1x1x8x16xbf16>,
    return
  }
  func.func @transform_0(%arg0: i32, %arg1: i32) -> (i32, i32, i32) {
    %c0_i32 = arith.constant 0 : i32
    %c0_i32_0 = arith.constant 0 : i32
    return %arg0, %arg1, %c0_i32 : i32, i32, i32
  }
  func.func @transform_1(%arg0: i32, %arg1: i32) -> (i32, i32) {
    %c0_i32 = arith.constant 0 : i32
    %c0_i32_0 = arith.constant 0 : i32
    %c0_i32_1 = arith.constant 0 : i32
    return %c0_i32, %c0_i32_0 : i32, i32
  }
  func.func @transform_2(%arg0: i32, %arg1: i32) -> (i32, i32) {
    %c0_i32 = arith.constant 0 : i32
    %c0_i32_0 = arith.constant 0 : i32
    %c0_i32_1 = arith.constant 0 : i32
    return %c0_i32, %c0_i32_0 : i32, i32
  }
  func.func @transform_3(%arg0: i32, %arg1: i32) -> (i32, i32) {
    %c0_i32 = arith.constant 0 : i32
    %c0_i32_0 = arith.constant 0 : i32
    %c0_i32_1 = arith.constant 0 : i32
    return %c0_i32, %c0_i32_0 : i32, i32
  }
  func.func @transform_4(%arg0: i32, %arg1: i32) -> (i32, i32) {
    %c0_i32 = arith.constant 0 : i32
    %c0_i32_0 = arith.constant 0 : i32
    %c0_i32_1 = arith.constant 0 : i32
    return %c0_i32, %c0_i32_0 : i32, i32
  }
  func.func @transform_5(%arg0: i32, %arg1: i32) -> (i32, i32) {
    %c0_i32 = arith.constant 0 : i32
    %c0_i32_0 = arith.constant 0 : i32
    return %arg1, %c0_i32 : i32, i32
  }
  func.func @transform_6(%arg0: i32, %arg1: i32) -> (i32, i32) {
    %c0_i32 = arith.constant 0 : i32
    %c0_i32_0 = arith.constant 0 : i32
    return %arg1, %c0_i32 : i32, i32
  }
  func.func @transform_7(%arg0: i32, %arg1: i32) -> (i32, i32) {
    %c0_i32 = arith.constant 0 : i32
    %c0_i32_0 = arith.constant 0 : i32
    return %arg1, %c0_i32 : i32, i32
  }
  func.func @transform_8(%arg0: i32, %arg1: i32) -> (i32, i32) {
    %c0_i32 = arith.constant 0 : i32
    %c0_i32_0 = arith.constant 0 : i32
    return %arg1, %c0_i32 : i32, i32
  }
  func.func @transform_9(%arg0: i32, %arg1: i32) -> (i32, i32, i32, i32) {
    %c0_i32 = arith.constant 0 : i32
    %c0_i32_0 = arith.constant 0 : i32
    %c0_i32_1 = arith.constant 0 : i32
    return %arg0, %c0_i32, %arg1, %c0_i32_0 : i32, i32, i32, i32
  }
  func.func @transform_10(%arg0: i32, %arg1: i32) -> (i32, i32, i32, i32) {
    %c0_i32 = arith.constant 0 : i32
    %c0_i32_0 = arith.constant 0 : i32
    %c0_i32_1 = arith.constant 0 : i32
    return %arg0, %c0_i32, %arg1, %c0_i32_0 : i32, i32, i32, i32
  }
  func.func @transform_11(%arg0: i32, %arg1: i32) -> (i32, i32, i32, i32) {
    %c0_i32 = arith.constant 0 : i32
    %c0_i32_0 = arith.constant 0 : i32
    %c0_i32_1 = arith.constant 0 : i32
    return %arg0, %c0_i32, %arg1, %c0_i32_0 : i32, i32, i32, i32
  }
  func.func @transform_12(%arg0: i32, %arg1: i32) -> (i32, i32, i32, i32) {
    %c0_i32 = arith.constant 0 : i32
    %c0_i32_0 = arith.constant 0 : i32
    %c0_i32_1 = arith.constant 0 : i32
    return %arg0, %c0_i32, %arg1, %c0_i32_0 : i32, i32, i32, i32
  }
}

module attributes {stable_mosaic.version = 11 : i64} {
  func.func @ffn_kernel(%arg0: i32, %arg1: memref<16x32xbf16, #tpu.memory_space<vmem>>, %arg2: memref<1x32xf32, #tpu.memory_space<vmem>>, %arg3: memref<1x32xf32, #tpu.memory_space<vmem>>, %arg4: memref<32x64xbf16, #tpu.memory_space<vmem>>, %arg5: memref<1x64xf32, #tpu.memory_space<vmem>>, %arg6: memref<64x32xbf16, #tpu.memory_space<vmem>>, %arg7: memref<1x32xf32, #tpu.memory_space<vmem>>, %arg8: memref<16x32xbf16, #tpu.memory_space<vmem>>) attributes {dimension_semantics = [#tpu.dimension_semantics<parallel>], iteration_bounds = array<i64: 1>, scalar_prefetch = 0 : i64, scratch_operands = 0 : i64, tpu.core_type = #tpu.core_type<tc>, window_params = [{transform_indices = @transform_0, window_bounds = array<i64: 16, 32>}, {pipeline_mode = #tpu.pipeline_mode<synchronous>, transform_indices = @transform_1, window_bounds = array<i64: 1, 32>}, {pipeline_mode = #tpu.pipeline_mode<synchronous>, transform_indices = @transform_2, window_bounds = array<i64: 1, 32>}, {pipeline_mode = #tpu.pipeline_mode<synchronous>, transform_indices = @transform_3, window_bounds = array<i64: 32, 64>}, {pipeline_mode = #tpu.pipeline_mode<synchronous>, transform_indices = @transform_4, window_bounds = array<i64: 1, 64>}, {pipeline_mode = #tpu.pipeline_mode<synchronous>, transform_indices = @transform_5, window_bounds = array<i64: 64, 32>}, {pipeline_mode = #tpu.pipeline_mode<synchronous>, transform_indices = @transform_6, window_bounds = array<i64: 1, 32>}, {transform_indices = @transform_7, window_bounds = array<i64: 16, 32>}]} {
    %c0 = arith.constant 0 : index
    %c0_0 = arith.constant 0 : index
    %0 = vector.load %arg1[%c0, %c0_0] : memref<16x32xbf16, #tpu.memory_space<vmem>>, vector<16x32xbf16>
    %1 = arith.extf %0 : vector<16x32xbf16> to vector<16x32xf32>
    %cst = arith.constant dense<0.000000e+00> : vector<16xf32>
    %2 = vector.multi_reduction <add>, %1, %cst [1] : vector<16x32xf32> to vector<16xf32>
    %3 = vector.shape_cast %2 : vector<16xf32> to vector<16x1xf32>
    %cst_1 = arith.constant 3.200000e+01 : f32
    %4 = vector.broadcast %cst_1 : f32 to vector<16x1xf32>
    %5 = arith.divf %3, %4 : vector<16x1xf32>
    %6 = vector.broadcast %5 : vector<16x1xf32> to vector<16x32xf32>
    %7 = arith.subf %1, %6 : vector<16x32xf32>
    %8 = arith.mulf %7, %7 : vector<16x32xf32>
    %cst_2 = arith.constant dense<0.000000e+00> : vector<16xf32>
    %9 = vector.multi_reduction <add>, %8, %cst_2 [1] : vector<16x32xf32> to vector<16xf32>
    %10 = vector.shape_cast %9 : vector<16xf32> to vector<16x1xf32>
    %cst_3 = arith.constant 3.200000e+01 : f32
    %11 = vector.broadcast %cst_3 : f32 to vector<16x1xf32>
    %12 = arith.divf %10, %11 : vector<16x1xf32>
    %13 = vector.broadcast %5 : vector<16x1xf32> to vector<16x32xf32>
    %14 = arith.subf %1, %13 : vector<16x32xf32>
    %cst_4 = arith.constant 9.99999974E-6 : f32
    %15 = vector.broadcast %cst_4 : f32 to vector<16x1xf32>
    %16 = arith.addf %12, %15 : vector<16x1xf32>
    %17 = math.rsqrt %16 : vector<16x1xf32>
    %18 = vector.broadcast %17 : vector<16x1xf32> to vector<16x32xf32>
    %19 = arith.mulf %14, %18 : vector<16x32xf32>
    %c0_5 = arith.constant 0 : index
    %c0_6 = arith.constant 0 : index
    %20 = vector.load %arg2[%c0_5, %c0_6] : memref<1x32xf32, #tpu.memory_space<vmem>>, vector<1x32xf32>
    %21 = vector.broadcast %20 : vector<1x32xf32> to vector<16x32xf32>
    %22 = arith.mulf %19, %21 : vector<16x32xf32>
    %c0_7 = arith.constant 0 : index
    %c0_8 = arith.constant 0 : index
    %23 = vector.load %arg3[%c0_7, %c0_8] : memref<1x32xf32, #tpu.memory_space<vmem>>, vector<1x32xf32>
    %24 = vector.broadcast %23 : vector<1x32xf32> to vector<16x32xf32>
    %25 = arith.addf %22, %24 : vector<16x32xf32>
    %26 = arith.truncf %25 : vector<16x32xf32> to vector<16x32xbf16>
    %c0_9 = arith.constant 0 : index
    %c0_10 = arith.constant 0 : index
    %27 = vector.load %arg4[%c0_9, %c0_10] : memref<32x64xbf16, #tpu.memory_space<vmem>>, vector<32x64xbf16>
    %cst_11 = arith.constant dense<0.000000e+00> : vector<16x64xf32>
    %28 = tpu.matmul %26, %27, %cst_11 {dimension_numbers = #tpu.dot_dimension_numbers<[1], [0], [0], [1], [0, 0, 1, 1], [], []>} : vector<16x32xbf16>, vector<32x64xbf16>, vector<16x64xf32> -> vector<16x64xf32>
    %c0_12 = arith.constant 0 : index
    %c0_13 = arith.constant 0 : index
    %29 = vector.load %arg5[%c0_12, %c0_13] : memref<1x64xf32, #tpu.memory_space<vmem>>, vector<1x64xf32>
    %30 = vector.broadcast %29 : vector<1x64xf32> to vector<16x64xf32>
    %31 = arith.addf %28, %30 : vector<16x64xf32>
    %32 = arith.mulf %31, %31 : vector<16x64xf32>
    %33 = arith.mulf %31, %32 : vector<16x64xf32>
    %cst_14 = arith.constant 4.471500e-02 : f32
    %34 = vector.broadcast %cst_14 : f32 to vector<16x64xf32>
    %35 = arith.mulf %34, %33 : vector<16x64xf32>
    %36 = arith.addf %31, %35 : vector<16x64xf32>
    %cst_15 = arith.constant 0.797884583 : f32
    %37 = vector.broadcast %cst_15 : f32 to vector<16x64xf32>
    %38 = arith.mulf %37, %36 : vector<16x64xf32>
    %39 = math.tanh %38 : vector<16x64xf32>
    %cst_16 = arith.constant 1.000000e+00 : f32
    %40 = vector.broadcast %cst_16 : f32 to vector<16x64xf32>
    %41 = arith.addf %40, %39 : vector<16x64xf32>
    %cst_17 = arith.constant 5.000000e-01 : f32
    %42 = vector.broadcast %cst_17 : f32 to vector<16x64xf32>
    %43 = arith.mulf %42, %41 : vector<16x64xf32>
    %44 = arith.mulf %31, %43 : vector<16x64xf32>
    %45 = arith.truncf %44 : vector<16x64xf32> to vector<16x64xbf16>
    %c0_18 = arith.constant 0 : index
    %c0_19 = arith.constant 0 : index
    %46 = vector.load %arg6[%c0_18, %c0_19] : memref<64x32xbf16, #tpu.memory_space<vmem>>, vector<64x32xbf16>
    %cst_20 = arith.constant dense<0.000000e+00> : vector<16x32xf32>
    %47 = tpu.matmul %45, %46, %cst_20 {dimension_numbers = #tpu.dot_dimension_numbers<[1], [0], [0], [1], [0, 0, 1, 1], [], []>} : vector<16x64xbf16>, vector<64x32xbf16>, vector<16x32xf32> -> vector<16x32xf32>
    %c0_21 = arith.constant 0 : index
    %c0_22 = arith.constant 0 : index
    %48 = vector.load %arg7[%c0_21, %c0_22] : memref<1x32xf32, #tpu.memory_space<vmem>>, vector<1x32xf32>
    %49 = vector.broadcast %48 : vector<1x32xf32> to vector<16x32xf32>
    %50 = arith.addf %47, %49 : vector<16x32xf32>
    %51 = arith.addf %50, %1 : vector<16x32xf32>
    %52 = arith.truncf %51 : vector<16x32xf32> to vector<16x32xbf16>
    %c0_23 = arith.constant 0 : index
    %c0_24 = arith.constant 0 : index
    %53 = vector.load %arg8[%c0_23, %c0_24] : memref<16x32xbf16, #tpu.memory_space<vmem>>, vector<16x32xbf16>
    tpu.vector_store %arg8[%c0_23, %c0_24], %52 {strides = array<i32>} : memref<16x32xbf16, #tpu.memory_space<vmem>>, vector<16x32xbf16>,
    return
  }
  func.func @transform_0(%arg0: i32) -> (i32, i32) {
    %c0_i32 = arith.constant 0 : i32
    %c0_i32_0 = arith.constant 0 : i32
    return %arg0, %c0_i32 : i32, i32
  }
  func.func @transform_1(%arg0: i32) -> (i32, i32) {
    %c0_i32 = arith.constant 0 : i32
    %c0_i32_0 = arith.constant 0 : i32
    %c0_i32_1 = arith.constant 0 : i32
    return %c0_i32, %c0_i32_0 : i32, i32
  }
  func.func @transform_2(%arg0: i32) -> (i32, i32) {
    %c0_i32 = arith.constant 0 : i32
    %c0_i32_0 = arith.constant 0 : i32
    %c0_i32_1 = arith.constant 0 : i32
    return %c0_i32, %c0_i32_0 : i32, i32
  }
  func.func @transform_3(%arg0: i32) -> (i32, i32) {
    %c0_i32 = arith.constant 0 : i32
    %c0_i32_0 = arith.constant 0 : i32
    %c0_i32_1 = arith.constant 0 : i32
    return %c0_i32, %c0_i32_0 : i32, i32
  }
  func.func @transform_4(%arg0: i32) -> (i32, i32) {
    %c0_i32 = arith.constant 0 : i32
    %c0_i32_0 = arith.constant 0 : i32
    %c0_i32_1 = arith.constant 0 : i32
    return %c0_i32, %c0_i32_0 : i32, i32
  }
  func.func @transform_5(%arg0: i32) -> (i32, i32) {
    %c0_i32 = arith.constant 0 : i32
    %c0_i32_0 = arith.constant 0 : i32
    %c0_i32_1 = arith.constant 0 : i32
    return %c0_i32, %c0_i32_0 : i32, i32
  }
  func.func @transform_6(%arg0: i32) -> (i32, i32) {
    %c0_i32 = arith.constant 0 : i32
    %c0_i32_0 = arith.constant 0 : i32
    %c0_i32_1 = arith.constant 0 : i32
    return %c0_i32, %c0_i32_0 : i32, i32
  }
  func.func @transform_7(%arg0: i32) -> (i32, i32) {
    %c0_i32 = arith.constant 0 : i32
    %c0_i32_0 = arith.constant 0 : i32
    return %arg0, %c0_i32 : i32, i32
  }
}

module attributes {stable_mosaic.version = 11 : i64} {
  func.func @vae_head_kernel(%arg0: i32, %arg1: memref<16x32xbf16, #tpu.memory_space<vmem>>, %arg2: memref<1x32xf32, #tpu.memory_space<vmem>>, %arg3: memref<1x32xf32, #tpu.memory_space<vmem>>, %arg4: memref<32x16xbf16, #tpu.memory_space<vmem>>, %arg5: memref<1x16xf32, #tpu.memory_space<vmem>>, %arg6: memref<16x16xf32, #tpu.memory_space<vmem>>) attributes {dimension_semantics = [#tpu.dimension_semantics<parallel>], iteration_bounds = array<i64: 1>, scalar_prefetch = 0 : i64, scratch_operands = 0 : i64, tpu.core_type = #tpu.core_type<tc>, window_params = [{transform_indices = @transform_0, window_bounds = array<i64: 16, 32>}, {pipeline_mode = #tpu.pipeline_mode<synchronous>, transform_indices = @transform_1, window_bounds = array<i64: 1, 32>}, {pipeline_mode = #tpu.pipeline_mode<synchronous>, transform_indices = @transform_2, window_bounds = array<i64: 1, 32>}, {pipeline_mode = #tpu.pipeline_mode<synchronous>, transform_indices = @transform_3, window_bounds = array<i64: 32, 16>}, {pipeline_mode = #tpu.pipeline_mode<synchronous>, transform_indices = @transform_4, window_bounds = array<i64: 1, 16>}, {transform_indices = @transform_5, window_bounds = array<i64: 16, 16>}]} {
    %c0 = arith.constant 0 : index
    %c0_0 = arith.constant 0 : index
    %0 = vector.load %arg1[%c0, %c0_0] : memref<16x32xbf16, #tpu.memory_space<vmem>>, vector<16x32xbf16>
    %1 = arith.extf %0 : vector<16x32xbf16> to vector<16x32xf32>
    %cst = arith.constant dense<0.000000e+00> : vector<16xf32>
    %2 = vector.multi_reduction <add>, %1, %cst [1] : vector<16x32xf32> to vector<16xf32>
    %3 = vector.shape_cast %2 : vector<16xf32> to vector<16x1xf32>
    %cst_1 = arith.constant 3.200000e+01 : f32
    %4 = vector.broadcast %cst_1 : f32 to vector<16x1xf32>
    %5 = arith.divf %3, %4 : vector<16x1xf32>
    %6 = vector.broadcast %5 : vector<16x1xf32> to vector<16x32xf32>
    %7 = arith.subf %1, %6 : vector<16x32xf32>
    %8 = arith.mulf %7, %7 : vector<16x32xf32>
    %cst_2 = arith.constant dense<0.000000e+00> : vector<16xf32>
    %9 = vector.multi_reduction <add>, %8, %cst_2 [1] : vector<16x32xf32> to vector<16xf32>
    %10 = vector.shape_cast %9 : vector<16xf32> to vector<16x1xf32>
    %cst_3 = arith.constant 3.200000e+01 : f32
    %11 = vector.broadcast %cst_3 : f32 to vector<16x1xf32>
    %12 = arith.divf %10, %11 : vector<16x1xf32>
    %13 = vector.broadcast %5 : vector<16x1xf32> to vector<16x32xf32>
    %14 = arith.subf %1, %13 : vector<16x32xf32>
    %cst_4 = arith.constant 9.99999974E-6 : f32
    %15 = vector.broadcast %cst_4 : f32 to vector<16x1xf32>
    %16 = arith.addf %12, %15 : vector<16x1xf32>
    %17 = math.rsqrt %16 : vector<16x1xf32>
    %18 = vector.broadcast %17 : vector<16x1xf32> to vector<16x32xf32>
    %19 = arith.mulf %14, %18 : vector<16x32xf32>
    %c0_5 = arith.constant 0 : index
    %c0_6 = arith.constant 0 : index
    %20 = vector.load %arg2[%c0_5, %c0_6] : memref<1x32xf32, #tpu.memory_space<vmem>>, vector<1x32xf32>
    %21 = vector.broadcast %20 : vector<1x32xf32> to vector<16x32xf32>
    %22 = arith.mulf %19, %21 : vector<16x32xf32>
    %c0_7 = arith.constant 0 : index
    %c0_8 = arith.constant 0 : index
    %23 = vector.load %arg3[%c0_7, %c0_8] : memref<1x32xf32, #tpu.memory_space<vmem>>, vector<1x32xf32>
    %24 = vector.broadcast %23 : vector<1x32xf32> to vector<16x32xf32>
    %25 = arith.addf %22, %24 : vector<16x32xf32>
    %26 = arith.truncf %25 : vector<16x32xf32> to vector<16x32xbf16>
    %c0_9 = arith.constant 0 : index
    %c0_10 = arith.constant 0 : index
    %27 = vector.load %arg4[%c0_9, %c0_10] : memref<32x16xbf16, #tpu.memory_space<vmem>>, vector<32x16xbf16>
    %cst_11 = arith.constant dense<0.000000e+00> : vector<16x16xf32>
    %28 = tpu.matmul %26, %27, %cst_11 {dimension_numbers = #tpu.dot_dimension_numbers<[1], [0], [0], [1], [0, 0, 1, 1], [], []>} : vector<16x32xbf16>, vector<32x16xbf16>, vector<16x16xf32> -> vector<16x16xf32>
    %c0_12 = arith.constant 0 : index
    %c0_13 = arith.constant 0 : index
    %29 = vector.load %arg5[%c0_12, %c0_13] : memref<1x16xf32, #tpu.memory_space<vmem>>, vector<1x16xf32>
    %30 = vector.broadcast %29 : vector<1x16xf32> to vector<16x16xf32>
    %31 = arith.addf %28, %30 : vector<16x16xf32>
    %cst_14 = arith.constant 5.000000e-01 : f32
    %32 = vector.broadcast %cst_14 : f32 to vector<16x16xf32>
    %33 = arith.mulf %32, %31 : vector<16x16xf32>
    %cst_15 = arith.constant 0.000000e+00 : f32
    %34 = vector.broadcast %cst_15 : f32 to vector<16x16xf32>
    %35 = arith.maximumf %33, %34 : vector<16x16xf32>
    %36 = math.absf %33 : vector<16x16xf32>
    %cst_16 = arith.constant 0.000000e+00 : f32
    %37 = vector.broadcast %cst_16 : f32 to vector<16x16xf32>
    %38 = arith.subf %37, %36 : vector<16x16xf32>
    %39 = math.exp %38 : vector<16x16xf32>
    %cst_17 = arith.constant 1.000000e+00 : f32
    %40 = vector.broadcast %cst_17 : f32 to vector<16x16xf32>
    %41 = arith.addf %40, %39 : vector<16x16xf32>
    %42 = math.log %41 : vector<16x16xf32>
    %43 = arith.addf %35, %42 : vector<16x16xf32>
    %cst_18 = arith.constant 1.000000e-03 : f32
    %44 = vector.broadcast %cst_18 : f32 to vector<16x16xf32>
    %45 = arith.addf %43, %44 : vector<16x16xf32>
    %46 = tpu.iota {dimensions = array<i32: 1>} : vector<16x16xi32>
    %c8_i32 = arith.constant 8 : i32
    %47 = vector.broadcast %c8_i32 : i32 to vector<16x16xi32>
    %48 = arith.cmpi slt, %46, %47 : vector<16x16xi32>
    %49 = arith.select %48, %31, %45 : vector<16x16xi1>, vector<16x16xf32>
    %c0_19 = arith.constant 0 : index
    %c0_20 = arith.constant 0 : index
    %50 = vector.load %arg6[%c0_19, %c0_20] : memref<16x16xf32, #tpu.memory_space<vmem>>, vector<16x16xf32>
    tpu.vector_store %arg6[%c0_19, %c0_20], %49 {strides = array<i32>} : memref<16x16xf32, #tpu.memory_space<vmem>>, vector<16x16xf32>,
    return
  }
  func.func @transform_0(%arg0: i32) -> (i32, i32) {
    %c0_i32 = arith.constant 0 : i32
    %c0_i32_0 = arith.constant 0 : i32
    return %arg0, %c0_i32 : i32, i32
  }
  func.func @transform_1(%arg0: i32) -> (i32, i32) {
    %c0_i32 = arith.constant 0 : i32
    %c0_i32_0 = arith.constant 0 : i32
    %c0_i32_1 = arith.constant 0 : i32
    return %c0_i32, %c0_i32_0 : i32, i32
  }
  func.func @transform_2(%arg0: i32) -> (i32, i32) {
    %c0_i32 = arith.constant 0 : i32
    %c0_i32_0 = arith.constant 0 : i32
    %c0_i32_1 = arith.constant 0 : i32
    return %c0_i32, %c0_i32_0 : i32, i32
  }
  func.func @transform_3(%arg0: i32) -> (i32, i32) {
    %c0_i32 = arith.constant 0 : i32
    %c0_i32_0 = arith.constant 0 : i32
    %c0_i32_1 = arith.constant 0 : i32
    return %c0_i32, %c0_i32_0 : i32, i32
  }
  func.func @transform_4(%arg0: i32) -> (i32, i32) {
    %c0_i32 = arith.constant 0 : i32
    %c0_i32_0 = arith.constant 0 : i32
    %c0_i32_1 = arith.constant 0 : i32
    return %c0_i32, %c0_i32_0 : i32, i32
  }
  func.func @transform_5(%arg0: i32) -> (i32, i32) {
    %c0_i32 = arith.constant 0 : i32
    %c0_i32_0 = arith.constant 0 : i32
    return %arg0, %c0_i32 : i32, i32
  }
}

</mosaic_0001>

<bundles_post_ra>
// kernel: retnet_encoder_forward.5
= control target key start
LH: loop header
LB: loop body
LE: loop exit
PB: predicated region body
PF: predicated region fallthrough
CT: control target
= control target key end

     0   :  { %v111_v0 = vmov 0.0   ;;  %vm112_vm0 = vmmov 0   ;;  %vm33_vm1 = vcmask 130048   ;;  %vm86_vm2 = vcmask 257024   ;;  %s151_s1 = inlined_call_operand.vmem [shape: bf16[16,32], index: 1, kind: input, shape index: {}]   ;;  %s152_s0 = inlined_call_operand.vmem [shape: f32[16,16], index: 0, kind: input, shape index: {}]   ;;  %s153_s2 = inlined_call_operand.vmem [shape: f32[1,32], index: 2, kind: input, shape index: {}]   ;;  %s154_s3 = inlined_call_operand.vmem [shape: bf16[16,32], index: 3, kind: output, shape index: {}]  }
   0x1   :  { %102 = vmatprep.subr.bf16.mxu0 %v111_v0  ;;  %v110_v1 = vld [vmem:[%s151_s1] sm:$0xff]   ;;  %104 = vmatprep.mubr.msk.bf16.mxu0 %vm112_vm0, %v111_v0  ;;  %v16_v3 = vld [vmem:[%s152_s0 + $0x8] sm:$0xff] }
   0x2   :  { %v15_v2 = vld [vmem:[%s152_s0] sm:$0xff]  ;;  %103 = vmatpush3.bf16.msra.mxu0 %v110_v1 }
   0x3   :  { %v17_v4 = vpack.c.bf16 %v16_v3, %v15_v2  ;;  %v93_v5 = vld [vmem:[%s153_s2] ss:$0 sm:$0xff] }
   0x5   :  { %105 = vmatmul.mubr.msk.bf16.vlgmr.msra.gmra.mrb[0].mxu0 %vm33_vm1, %v17_v4 }
  0xd8   :  { %v71_v6 = vpop.f32.mrb[0].mxu0 }
  0xd9   :  { %v72_v7 = vadd.f32 %v93_v5, %v71_v6  ;;  %v106_v8 = vpop.f32.mrb[1].mxu0 }
  0xda   :  { %v74_v9 = vpop.f32.mrb[2].mxu0 }
  0xdb   :  { %v98_v10 = vpack.c.bf16 %v72_v7, %v72_v7  ;;  %v75_v11 = vadd.f32 %v93_v5, %v74_v9  ;;  %v107_v12 = vpop.f32.mrb[3].mxu0 }
  0xdd   :  { %87 = vst.msk [vmem:[%s154_s3] sm:$0xf] %vm86_vm2, %v98_v10  ;;  %v99_v13 = vpack.c.bf16 %v75_v11, %v75_v11 }
  0xdf   :  { %88 = vst.msk [vmem:[%s154_s3 + $0x4] sm:$0xf] %vm86_vm2, %v99_v13 }

// kernel: retnet_encoder_forward.7
= control target key start
LH: loop header
LB: loop body
LE: loop exit
PB: predicated region body
PF: predicated region fallthrough
CT: control target
= control target key end

     0   :  { %s1298_s30 = smov 0   ;;  %s1300_s10 = smov 0   ;;  %s1416_s0 = inlined_call_operand.vmem [shape: bf16[2,8,32], index: 0, kind: input, shape index: {}]   ;;  %s1417_s1 = inlined_call_operand.vmem [shape: bf16[2,2,8,16], index: 1, kind: input, shape index: {}]   ;;  %s1418_s2 = inlined_call_operand.vmem [shape: bf16[2,2,8,16], index: 2, kind: input, shape index: {}]   ;;  %s1419_s3 = inlined_call_operand.vmem [shape: bf16[2,2,8,16], index: 3, kind: input, shape index: {}]   ;;  %s1420_s4 = inlined_call_operand.vmem [shape: bf16[2,2,8,16], index: 4, kind: input, shape index: {}]   ;;  %s1421_s5 = inlined_call_operand.vmem [shape: f32[2,1,1], index: 5, kind: input, shape index: {}]   ;;  %s1422_s6 = inlined_call_operand.vmem [shape: f32[2,1,16], index: 6, kind: input, shape index: {}]   ;;  %s1423_s7 = inlined_call_operand.vmem [shape: f32[2,1,16], index: 7, kind: input, shape index: {}]   ;;  %s1424_s8 = inlined_call_operand.vmem [shape: bf16[2,16,32], index: 8, kind: input, shape index: {}]   ;;  %s1425_s9 = inlined_call_operand.vmem [shape: bf16[2,8,32], index: 9, kind: output, shape index: {}]  }
   0x1   :  { %1426 = sst [smem:[#allocation4_spill]] %s1416_s0  ;;  %s1302_s11 = smov 0  }
   0x2   :  { %1427 = sst [smem:[#allocation5_spill]] %s1417_s1  ;;  %s1304_s12 = smov 0  }
   0x3   :  { %s1306_s13 = smov 0  }
   0x4 LB: > { %s37_s14 = sadd.s32 1, %s1235_s11  ;;  %s45_s15 = sadd.s32 1, %s1239_s12  ;;  %s1243_s13 = sphi %s1306_s13, %s19_s13   ;;  %s1239_s12 = sphi %s1304_s12, %s1433_s12   ;;  %s1235_s11 = sphi %s1302_s11, %s1432_s11   ;;  %s1231_s10 = sphi %s1300_s10, %s1431_s10   ;;  %s1227_s30 = sphi %s1298_s30, %s1430_s30  }
   0x5   : > { %p39_p0 = scmp.ge.s32.totalorder %s37_s14, 2  ;;  %p1106_p1 = scmp.ge.s32.totalorder %s1243_s13, 1 }
   0x6   : > { %p449_p2 = scmp.lt.s32.totalorder %s1243_s13, 5 }
   0x7   : > { %s1435_s14 = smov (%p39_p0, %s37_s14), 0  ;;  %s1437_s15 = smov (!%p39_p0, %s45_s15), %s1239_s12 }
   0x8   : > { %p450_p3 = pnand %p1106_p1, %p449_p2  ;;  %p47_p4 = scmp.ge.s32.totalorder %s1437_s15, 2 }
   0x9   : > { %p551_p5 = scmp.lt.s32.totalorder (!%p450_p3), %s1231_s10, 1  ;;  %p560_p6 = scmp.lt.s32.totalorder (!%p450_p3), %s1227_s30, 1  ;;  %vm636_vm0 = vcmask (!%p450_p3), 130048   ;;  %v1245_v0 = vmov (!%p450_p3), 0.0   ;;  %vm1246_vm1 = vmmov (!%p450_p3), 0   ;;  %v643_v1 = vlaneseq (!%p450_p3) }
   0xa   : > { %s1439_s15 = smov (%p47_p4, %s1437_s15), 0  ;;  %453 = sbr.rel (%p450_p3) target bundleno = 1016 (0x3f8), region = 56 }
   0xb   : > { %1136 = vmatprep.subr.bf16.mxu0 (!%p450_p3), %v1245_v0  ;;  %637 = vst.msk [vmem:[#allocation2] sm:$0xff] (!%p450_p3), %vm636_vm0, %v1245_v0  ;;  %1138 = vmatprep.mubr.msk.bf16.mxu0 (!%p450_p3), %vm1246_vm1, %v1245_v0  ;;  %v1247_v2 = vmov (!%p450_p3), 0   ;;  %v644_v3 = vshrl.u32 (!%p450_p3), %v643_v1, 7  ;;  %s1428_s0 = sld [smem:[#allocation4_spill]] (!%p450_p3)  ;;  %s1429_s1 = sld [smem:[#allocation5_spill]] (!%p450_p3)  ;;  %v646_v15 = vand.u32 (!%p450_p3), 127, %v643_v1 }
   0xc   : > { %1197 = vset.pattern.permute.xlu0 (!%p450_p3), %v1247_v2  ;;  %1142 = vmatprep.subr.bf16.mxu1 (!%p450_p3), %v1245_v0  ;;  %vm740_vm3 = vcmask (!%p450_p3), 1043456   ;;  %vm736_vm4 = vcmask (!%p450_p3), 64512   ;;  %p1125_p7 = scmp.ne.s32.totalorder (!%p450_p3), %s1227_s30, 0 }
   0xd   : > { %1144 = vmatprep.mubr.msk.bf16.mxu1 (!%p450_p3), %vm1246_vm1, %v1245_v0  ;;  %v655_v4 = vsub.s32 (!%p450_p3), 0, %v644_v3  ;;  %v651_v6 = vcvt.s32.f32 (!%p450_p3), %v644_v3  ;;  %vm675_vm2 = vcmp.ge.s32.totalorder (!%p450_p3), %v644_v3, %v646_v15  ;;  %v661_v18 = vcvt.s32.f32 (!%p450_p3), %v646_v15 }
  0x11   : > { %s1441_s10 = smov (!%p551_p5, %s1231_s10), 1  ;;  %vm882_vm5 = vcmask (!%p1125_p7), 261120  }
  0x12   : > { %s1338_s16 = scalar_select %p560_p6, %s1227_s30, 1  ;;  %v733_v33 = vld [vmem:[#allocation2] sm:$0xff] }
  0x13   : > { %s1107_s17 = sshll.u32 %s1441_s10, 2  ;;  %s1108_s18 = sshll.u32 %s1441_s10, 1 }
  0x14   : > { %s1345_s21 = scalar_lea.vmem %s1428_s0, %s1107_s17  ;;  %s566_s22 = sadd.s32 %s1108_s18, %s1338_s16 }
  0x15   : > { %s1348_s23 = sshll.u32 %s566_s22, 2  ;;  %s1353_s26 = scalar_lea.vmem %s1425_s9, %s1107_s17 }
  0x16   : > { %s581_s29 = scalar_lea.vmem %s1418_s2, %s1348_s23  ;;  %s612_s20 = scalar_lea.vmem %s1421_s5, %s1338_s16 }
  0x17   : > { %v684_v5 = vld [vmem:[%s581_s29] sm:$0xf]  ;;  %s568_s22 = scalar_lea.vmem %s1429_s1, %s1348_s23  ;;  %s596_s27 = scalar_lea.vmem %s1419_s3, %s1348_s23 }
  0x18   : > { %v690_v7 = vsel %vm636_vm0, %v684_v5, 0  ;;  %v642_v8 = vld [vmem:[%s612_s20] sm:$0x1]  ;;  %s1129_s28 = sshll.u32 %s1338_s16, 3  ;;  %s609_s18 = scalar_lea.vmem %s1420_s4, %s1348_s23 }
  0x19   : > { %1137 = vmatpush3.bf16.xpose.msra.mxu0 %v690_v7  ;;  %v662_v9 = vsub.f32 0.0, %v642_v8  ;;  %v656_v10 = vrot.slane %v642_v8, %v655_v4  ;;  %v683_v12 = vld [vmem:[%s568_s22] sm:$0xf]  ;;  %s623_s19 = scalar_lea.vmem %s1424_s8, %s1129_s28  ;;  %s615_s25 = scalar_lea.vmem %s1422_s6, %s1338_s16 }
  0x1a   : > { %v735_v16 = vld [vmem:[%s596_s27] sm:$0xf]  ;;  %s618_s1 = scalar_lea.vmem %s1423_s7, %s1338_s16 }
  0x1b   : > { %665 = vperm.xlu0 %1197, %v662_v9   ;;  %v658_v11 = vmul.f32 %v656_v10, %v651_v6  ;;  %v742_v17 = vsel %vm740_vm3, %v735_v16, 0  ;;  %v1198_v46 = vld [vmem:[%s623_s19] sm:$0xff]  }
  0x1c   : > { %1143 = vmatpush3.bf16.msra.mxu1 %v742_v17  ;;  %v821_v51 = vld [vmem:[%s609_s18] sm:$0xf] }
  0x1d   : > { %v659_v13 = vmul.f32 1.442695, %v658_v11  ;;  %1148 = vmatprep.subr.bf16.mxu1 %v1245_v0  ;;  %v1121_v52 = vld [vmem:[%s615_s25] ss:$0 sm:$0xff]  ;;  %v822_v55 = vunpack.c.l.bf16 %v821_v51 }
  0x1e   : > { %v1122_v54 = vld [vmem:[%s618_s1] ss:$0 sm:$0xff] }
  0x1f   : > { %1199 = vpow2.f32 %v659_v13 }
  0x20   : > { %1139 = vmatmul.mubr.msk.bf16.vlgmr.msra.gmra.mrb[0].mxu0 %vm636_vm0, %v683_v12 }
  0x29   : > { %v1200_v14 = vpop.eup %1199 }
  0x2a   : > { %678 = vperm.xlu0 %1197, %v1200_v14  }
  0x9a   : > { %v666_v19 = vpop.permute.xlu0 %665 }
  0x9b   : > { %v671_v20 = vrot.slane %v666_v19, %v655_v4 }
  0x9d   : > { %v672_v21 = vmul.f32 %v671_v20, %v661_v18 }
  0x9f   : > { %v673_v22 = vmul.f32 1.442695, %v672_v21 }
  0xa1   : > { %1201 = vpow2.f32 %v673_v22 }
  0xa9   : > { %v679_v23 = vpop.permute.xlu0 %678 }
  0xab   : > { %v1202_v24 = vpop.eup %1201 }
  0xac   : > { %v681_v25 = vmul.f32 %v1202_v24, %v679_v23 }
  0xae   : > { %v682_v26 = vsel %vm675_vm2, %v681_v25, 0.0 }
  0xf3   : > { %v726_v27 = vpop.f32.mrb[0].mxu0 }
  0xf4   : > { %v732_v28 = vmul.f32 %v726_v27, %v682_v26  ;;  %v1140_v29 = vpop.f32.mrb[1].mxu0 }
  0xf5   : > { %v729_v30 = vpop.f32.mrb[2].mxu0 }
  0xf6   : > { %v734_v31 = vpack.c.bf16 %v732_v28, %v732_v28  ;;  %v1141_v32 = vpop.f32.mrb[3].mxu0 }
  0xf8   : > { %1145 = vmatmul.mubr.msk.bf16.vlgmr.msra.gmra.mrb[0].mxu1 %vm736_vm4, %v734_v31 }
  0xf9   : > { %1150 = vmatprep.mubr.msk.bf16.mxu1 %vm1246_vm1, %v1245_v0  ;;  %1149 = vmatpush3.bf16.msra.mxu1 %v1198_v46  ;;  %v880_v0 = vld [vmem:[%s1345_s21] sm:$0xf] (!%p1125_p7) }
  0xfa   : > { %v881_v1 = vunpack.c.l.bf16 (!%p1125_p7), %v880_v0 }
  0xfc   : > { %883 = vst.msk [vmem:[#allocation3] sm:$0xff] (!%p1125_p7), %vm882_vm5, %v881_v1 }
 0x1cb   : > { %v778_v34 = vpop.f32.mrb[0].mxu1 }
 0x1cc   : > { %v784_v35 = vadd.f32 %v778_v34, %v733_v33  ;;  %v1146_v36 = vpop.f32.mrb[1].mxu1 }
 0x1cd   : > { %v781_v37 = vpop.f32.mrb[2].mxu1 }
 0x1ce   : > { %785 = vst.msk [vmem:[#allocation2] sm:$0xff] %vm636_vm0, %v784_v35  ;;  %v1147_v38 = vpop.f32.mrb[3].mxu1 }
 0x1d5   : > { %v789_v39 = vld [vmem:[#allocation2] sm:$0xff] }
 0x1d6   : > { %v791_v40 = vsel %vm636_vm0, %v789_v39, 0.0 }
 0x1d7   : > { %792 = vadd.xlane.f32.xlu1 %v791_v40 }
 0x264   : > { %v793_v41 = vpop.xlane.xlu1 %792 }
 0x265   : > { %v795_v42 = vmul.f32 0.0625, %v793_v41 }
 0x267   : > { %v796_v43 = vsub.f32 %v789_v39, %v795_v42 }
 0x269   : > { %v797_v44 = vmul.f32 %v796_v43, %v796_v43 }
 0x26b   : > { %v798_v45 = vsel %vm636_vm0, %v797_v44, 0.0 }
 0x26c   : > { %799 = vadd.xlane.f32.xlu1 %v798_v45 }
 0x2f9   : > { %v800_v47 = vpop.xlane.xlu1 %799 }
 0x2fa   : > { %v801_v48 = vmul.f32 0.0625, %v800_v47 }
 0x2fc   : > { %v802_v49 = vadd.f32 1e-05, %v801_v48 }
 0x2fe   : > { %1203 = vrsqrt.f32 %v802_v49 }
 0x308   : > { %v1204_v50 = vpop.eup %1203 }
 0x309   : > { %v804_v53 = vmul.f32 %v1204_v50, %v796_v43 }
 0x30b   : > { %v812_v56 = vmul.f32 %v1121_v52, %v804_v53 }
 0x30d   : > { %v820_v57 = vadd.f32 %v1122_v54, %v812_v56 }
 0x30f   : > { %v823_v58 = vmul.f32 %v822_v55, %v820_v57 }
 0x311   : > { %v824_v59 = vpack.c.bf16 %v823_v58, %v823_v58 }
 0x313   : > { %1151 = vmatmul.mubr.msk.bf16.vlgmr.msra.gmra.mrb[4].mxu1 %vm636_vm0, %v824_v59 }
 0x3e3   : > { %879 = sbr.rel (%p1125_p7) target bundleno = 1002 (0x3ea), region = 72 }
 0x3e6   : > { %v870_v60 = vpop.f32.mrb[4].mxu1 }
 0x3e7   : > { %v1152_v61 = vpop.f32.mrb[5].mxu1 }
 0x3e8   : > { %v873_v62 = vpop.f32.mrb[6].mxu1 }
 0x3e9   : > { %v1153_v63 = vpop.f32.mrb[7].mxu1 }
 0x3ea PF: > { %v884_v2 = vld [vmem:[#allocation3] sm:$0xff]  ;;  %vm886_vm6 = vcmask 261120   ;;  %p1126_p8 = scmp.ne.s32.totalorder %s1227_s30, 1 }
 0x3eb   : > { %v885_v3 = vadd.f32 %v884_v2, %v870_v60  ;;  %vm894_vm7 = vcmask (!%p1126_p8), 257024  }
 0x3ec   : > { %891 = sbr.rel (%p1126_p8) target bundleno = 1016 (0x3f8), region = 76 }
 0x3ed   : > { %887 = vst.msk [vmem:[#allocation3] sm:$0xff] %vm886_vm6, %v885_v3 }
 0x3f4   : > { %v892_v4 = vld [vmem:[#allocation3] sm:$0xff] }
 0x3f5   : > { %v893_v5 = vpack.c.bf16 %v892_v4, %v892_v4 }
 0x3f7   : > { %895 = vst.msk [vmem:[%s1353_s26] sm:$0xf] %vm894_vm7, %v893_v5 }
 0x3f8 PF: > { %s19_s13 = sadd.s32 1, %s1243_s13   ;;  %s1430_s30 = smov %s1235_s11 }
 0x3f9   : > { %p16_p9 = scmp.ge.s32.totalorder %s19_s13, 6   ;;  %s1431_s10 = smov %s1239_s12 }
 0x3fa   : > { %s1432_s11 = smov %s1435_s14  ;;  %s1433_s12 = smov %s1439_s15 }
 0x3fb   :  { %18 = sbr.rel (!%p16_p9) target bundleno = 4 (0x4), region = 130 }

// kernel: retnet_encoder_forward.6
= control target key start
LH: loop header
LB: loop body
LE: loop exit
PB: predicated region body
PF: predicated region fallthrough
CT: control target
= control target key end

     0   :  { %18 = vsyncpa [#allocation3], 0  ;;  %s1616_s0 = inlined_call_operand.vmem [shape: bf16[2,8,32], index: 0, kind: input, shape index: {}]   ;;  %s1617_s1 = inlined_call_operand.hbm [shape: f32[1,32], index: 1, kind: input, shape index: {}]   ;;  %s1618_s2 = inlined_call_operand.hbm [shape: f32[1,32], index: 2, kind: input, shape index: {}]   ;;  %s1619_s3 = inlined_call_operand.vmem [shape: bf16[32,160], index: 3, kind: input, shape index: {}]   ;;  %s1620_s4 = inlined_call_operand.vmem [shape: bf16[32,32], index: 4, kind: input, shape index: {}]   ;;  %s1621_s5 = inlined_call_operand.vmem [shape: f32[8,32], index: 5, kind: input, shape index: {}]   ;;  %s1622_s6 = inlined_call_operand.vmem [shape: f32[8,32], index: 6, kind: input, shape index: {}]   ;;  %s1623_s7 = inlined_call_operand.vmem [shape: f32[8,32], index: 7, kind: input, shape index: {}]   ;;  %s1624_s8 = inlined_call_operand.vmem [shape: f32[8,32], index: 8, kind: input, shape index: {}]   ;;  %s1625_s9 = inlined_call_operand.vmem [shape: bf16[2,2,8,16], index: 9, kind: output, shape index: {0}]   ;;  %s1626_s10 = inlined_call_operand.vmem [shape: bf16[2,2,8,16], index: 10, kind: output, shape index: {1}]   ;;  %s1627_s11 = inlined_call_operand.vmem [shape: bf16[2,2,8,16], index: 11, kind: output, shape index: {2}]   ;;  %s1628_s12 = inlined_call_operand.vmem [shape: bf16[2,2,8,16], index: 12, kind: output, shape index: {3}]  }
   0x1   :  { %19 = vsyncpa [#allocation5], 0  ;;  %s1432_s21 = smov 0   ;;  %s1434_s22 = smov 0  }
   0x2   :  { %s1436_s23 = smov 0  }
   0x3 LB: > { %s1141_s24 = sadd.s32 4294967295, %s1355_s23   ;;  %s37_s25 = sadd.s32 1, %s1351_s22  ;;  %s1355_s23 = sphi %s1436_s23, %s25_s23   ;;  %s1351_s22 = sphi %s1434_s22, %s1638_s22   ;;  %s1347_s21 = sphi %s1432_s21, %s1637_s21  }
   0x4   : > { %p39_p0 = scmp.ge.s32.totalorder %s37_s25, 2  ;;  %p1143_p1 = scmp.ge.s32.totalorder %s1355_s23, 1 }
   0x5   : > { %p370_p2 = scmp.lt.s32.totalorder %s1355_s23, 3  ;;  %p1457_p4 = scmp.eq.s32.totalorder %s1141_s24, 0 }
   0x6   : > { %s1640_s25 = smov (%p39_p0, %s37_s25), 0  ;;  %s1357_s28 = smov [#allocation2]  }
   0x7   : > { %p1453_p3 = pnand %p1143_p1, %p370_p2  ;;  %s383_s29 = sshll.u32 %s1357_s28, 4  ;;  %s384_s29 = int_to_ptr.vmem [resolvable:$true] %s383_s29 }
   0x8   : > { %s1633_s27 = scalar_select %p1457_p4, 1, 0 }
   0x9   : > { %s1632_s26 = scalar_select %p1453_p3, 1, 0 }
   0xa   : > { %p1210_p5 = pneg %p1453_p3  ;;  %s1358_s30 = smov [#allocation4]  }
   0xb   : > { %s394_s13 = sshll.u32 %s1358_s30, 4  ;;  %s1269_s17 = scalar_lea.hbm %s1617_s1, 16  ;;  %s1469_s13 = int_to_ptr.vmem [resolvable:$true] %s394_s13 }
   0xc   : > { %p1465_p6 = pnand %p1457_p4, %p1210_p5  ;;  %p1270_p7 = scmp.ne.s32.totalorder %s1617_s1, %s1269_s17 }
   0xd   : > { %p1276_p11 = scmp.lt.u32.totalorder %s1269_s17, %s1617_s1 }
   0xe   : > { %p1271_p8 = pneg %p1465_p6 }
  0x10   : > { %p1272_p9 = pnand %p1271_p8, %p1270_p7 }
  0x12   : > { %p1273_p10 = pneg %p1272_p9 }
  0x14   : > { %p1278_p12 = pnand %p1276_p11, %p1273_p10 }
  0x16   : > { %1281 = shalt.err (!%p1278_p12)
}
  0x17   : > { %s1282_s28 = scalar_lea.vmem %s384_s29, 16  ;;  %s1289_s30 = scalar_lea.vmem %s384_s29, 32 }
  0x18   : > { %p1283_p13 = scmp.ne.s32.totalorder %s384_s29, %s1282_s28  ;;  %p1290_p2 = scmp.lt.s32.totalorder %s384_s29, %s384_s29 }
  0x19   : > { %p1291_p5 = scmp.lt.s32.totalorder %s1289_s30, %s1282_s28 }
  0x1a   : > { %p1285_p0 = pnand %p1283_p13, %p1271_p8 }
  0x1b   : > { %p1292_p4 = por %p1291_p5, %p1290_p2 }
  0x1c   : > { %p1286_p1 = pneg %p1285_p0 }
  0x1e   : > { %p1293_p3 = pnand %p1292_p4, %p1286_p1 }
  0x20   : > { %1296 = shalt.err (!%p1293_p3)
}
  0x21   : > { %1213 = dma.hbm_to_vmem [thread:$0]  (!%p1465_p6), %s1617_s1, 16, %s384_s29, [#allocation3]  }
  0x22   : > { %s1297_s19 = scalar_lea.hbm %s1618_s2, 16 }
  0x23   : > { %p1298_p7 = scmp.ne.s32.totalorder %s1618_s2, %s1297_s19  ;;  %p1304_p3 = scmp.lt.u32.totalorder %s1297_s19, %s1618_s2 }
  0x25   : > { %p1300_p9 = pnand %p1298_p7, %p1271_p8 }
  0x27   : > { %p1301_p4 = pneg %p1300_p9 }
  0x29   : > { %p1306_p10 = pnand %p1304_p3, %p1301_p4 }
  0x2b   : > { %1309 = shalt.err (!%p1306_p10)
}
  0x2c   : > { %s1310_s29 = scalar_lea.vmem %s1469_s13, 16  ;;  %s1317_s15 = scalar_lea.vmem %s1469_s13, 32 }
  0x2d   : > { %p1311_p11 = scmp.ne.s32.totalorder %s1469_s13, %s1310_s29  ;;  %p1318_p0 = scmp.lt.s32.totalorder %s1469_s13, %s1469_s13 }
  0x2e   : > { %p1319_p1 = scmp.lt.s32.totalorder %s1317_s15, %s1310_s29 }
  0x2f   : > { %p1313_p12 = pnand %p1311_p11, %p1271_p8 }
  0x30   : > { %p1320_p2 = por %p1319_p1, %p1318_p0 }
  0x31   : > { %p1314_p13 = pneg %p1313_p12 }
  0x33   : > { %p1321_p5 = pnand %p1320_p2, %p1314_p13 }
  0x35   : > { %1324 = shalt.err (!%p1321_p5)
}
  0x36   : > { %1216 = dma.hbm_to_vmem [thread:$0]  (!%p1465_p6), %s1618_s2, 16, %s1469_s13, [#allocation5]  }
  0x37   : > { %p1635_p7 = scmp.ne.s32.totalorder %s1632_s26, 0 }
  0x38   : > { %p1636_p8 = scmp.ne.s32.totalorder (!%p1635_p7), %s1633_s27, 0 }
  0x39   : > { %451 = sbr.rel (%p1635_p7) target bundleno = 855 (0x357), region = 56 }
  0x40   : > { %1338 = dma.done.wait (%p1636_p8), [#allocation3], 16  }
  0x41   : > { %1340 = vsyncadd (%p1636_p8), [#allocation3], 4294967280 }
  0x42   : > { %1342 = dma.done.wait (%p1636_p8), [#allocation5], 16  }
  0x43   : > { %1344 = vsyncadd (%p1636_p8), [#allocation5], 4294967280  ;;  %p542_p9 = scmp.lt.s32.totalorder %s1347_s21, 1  ;;  %vm600_vm0 = vcmask 261120   ;;  %v1255_v8 = vld [vmem:[%s1619_s3 + $0x4] ss:$8 sps:$4 sm:$0xff]  }
  0x44   : > { %v1257_v9 = vld [vmem:[%s1619_s3] ss:$8 sps:$4 sm:$0xff]   ;;  %v1359_v11 = vmov 0.0   ;;  %v1259_v12 = vld [vmem:[%s1619_s3 + $0x14] ss:$8 sps:$4 sm:$0xff]   ;;  %659 = vmatprep.subr.bf16.mxu0 %v1255_v8  ;;  %v1360_v15 = vmov 0  }
  0x45   : > { %s1642_s21 = smov (!%p542_p9, %s1347_s21), 1  ;;  %v1258_v10 = vld [vmem:[%s1620_s4] sm:$0xff]   ;;  %1194 = vmatprep.subr.bf16.mxu1 %v1359_v11  ;;  %v1262_v13 = vld [vmem:[%s1620_s4 + $0x8] sm:$0xff]   ;;  %660 = vmatpush1.bf16.msra.mxu0 %v1257_v9  ;;  %v1261_v14 = vld [vmem:[%s1619_s3 + $0x10] ss:$8 sps:$4 sm:$0xff]   ;;  %vm1361_vm1 = vmmov 0  }
  0x46   : > { %s1154_s26 = sshll.u32 %s1642_s21, 2  ;;  %1195 = vmatpush3.bf16.msra.mxu1 %v1258_v10  ;;  %661 = vmatprep.subr.bf16.mxu0 %v1259_v12  ;;  %v702_v16 = vld [vmem:[%s1622_s6] sm:$0xff]  ;;  %s1362_s20 = smov 32   ;;  %vm797_vm2 = vcmask 125952  }
  0x47   : > { %s548_s18 = scalar_lea.vmem %s1616_s0, %s1154_s26  ;;  %1196 = vmatprep.subr.bf16.mxu1 %v1359_v11  ;;  %691 = vmatprep.mubr.bf16.mxu0 %v1360_v15  ;;  %v714_v17 = vld [vmem:[%s1623_s7] sm:$0xff]  ;;  %s1363_s30 = smov 64  }
  0x48   : > { %v598_v0 = vld [vmem:[%s548_s18] sm:$0xf]  ;;  %1198 = vmatprep.mubr.msk.bf16.mxu1 %vm1361_vm1, %v1359_v11  ;;  %704 = vrot.lane.b32.xlu1 %v702_v16, %s1362_s20  ;;  %s1364_s29 = smov 96   ;;  %s1571_s15 = sshll.u32 %s1642_s21, 3 }
  0x49   : > { %v599_v1 = vunpack.c.l.bf16 %v598_v0  ;;  %662 = vmatpush1.bf16.msra.mxu0 %v1261_v14  ;;  %v720_v18 = vld [vmem:[%s1624_s8] sm:$0xff]  ;;  %s1577_s26 = scalar_lea.vmem %s1627_s11, %s1571_s15  ;;  %s596_s14 = scalar_lea.vmem %s1628_s12, %s1571_s15 }
  0x4a   : > { %1197 = vmatpush3.bf16.msra.mxu1 %v1262_v13  ;;  %v1163_v23 = vld [vmem:[#allocation2] ss:$0 sm:$0xff]  ;;  %v1164_v25 = vld [vmem:[#allocation4] ss:$0 sm:$0xff]  ;;  %s1365_s18 = smov 112   ;;  %s572_s28 = scalar_lea.vmem %s1625_s9, %s1571_s15 }
  0x4b   : > { %v601_v2 = vsel %vm600_vm0, %v599_v1, 0.0  ;;  %v700_v49 = vld [vmem:[%s1621_s5] sm:$0xff]  ;;  %s580_s21 = scalar_lea.vmem %s1626_s10, %s1571_s15 }
  0x4c   : > { %602 = vadd.xlane.f32.xlu0 %v601_v2  ;;  %722 = vrot.lane.b32.xlu1 %v720_v18, %s1364_s29 }
  0xba   : > { %v705_v29 = vpop.permute.xlu1 %704 }
  0xbe   : > { %v723_v30 = vpop.permute.xlu1 %722 }
  0xd9   : > { %v603_v3 = vpop.xlane.xlu0 %602 }
  0xda   : > { %v605_v4 = vmul.f32 0.03125, %v603_v3 }
  0xdc   : > { %v606_v5 = vsub.f32 %v599_v1, %v605_v4 }
  0xde   : > { %v607_v6 = vmul.f32 %v606_v5, %v606_v5 }
  0xe0   : > { %v608_v7 = vsel %vm600_vm0, %v607_v6, 0.0 }
  0xe1   : > { %609 = vadd.xlane.f32.xlu0 %v608_v7 }
  0xf7   : > { %716 = vrot.lane.b32.xlu0 %v714_v17, %s1363_s30 }
 0x16e   : > { %v610_v19 = vpop.xlane.xlu0 %609 }
 0x16f   : > { %v611_v20 = vmul.f32 0.03125, %v610_v19 }
 0x171   : > { %v612_v21 = vadd.f32 1e-05, %v611_v20 }
 0x172   : > { %v717_v51 = vpop.permute.xlu0 %716 }
 0x173   : > { %1263 = vrsqrt.f32 %v612_v21 }
 0x17d   : > { %v1264_v22 = vpop.eup %1263 }
 0x17e   : > { %v614_v24 = vmul.f32 %v1264_v22, %v606_v5 }
 0x180   : > { %v622_v26 = vmul.f32 %v1163_v23, %v614_v24 }
 0x182   : > { %v630_v27 = vadd.f32 %v1164_v25, %v622_v26 }
 0x184   : > { %v631_v28 = vpack.c.bf16 %v630_v27, %v630_v27 }
 0x186   : > { %1169 = vmatmul.mubr.msk.bf16.vlgmr.msra.gmra.mrb[0].mxu0 %vm600_vm0, %v631_v28  ;;  %1199 = vmatmul.mubr.msk.bf16.vlgmr.msra.gmra.mrb[0].mxu1 %vm600_vm0, %v631_v28 }
 0x259   : > { %v693_v31 = vpop.f32.mrb[0].mxu0  ;;  %v783_v32 = vpop.f32.mrb[0].mxu1 }
 0x25a   : > { %v789_v33 = vsub.f32 0.0, %v783_v32  ;;  %v695_v34 = vpop.f32.mrb[1].mxu0  ;;  %v1200_v35 = vpop.f32.mrb[1].mxu1  ;;  %v707_v36 = vmul.f32 %v705_v29, %v693_v31  ;;  %v725_v43 = vmul.f32 %v723_v30, %v693_v31  ;;  %v701_v50 = vmul.f32 %v700_v49, %v693_v31 }
 0x25b   : > { %v732_v37 = vpack.c.bf16 %v695_v34, %v695_v34  ;;  %v697_v38 = vpop.f32.mrb[2].mxu0  ;;  %v786_v39 = vpop.f32.mrb[2].mxu1  ;;  %v719_v54 = vmul.f32 %v717_v51, %v693_v31 }
 0x25c   : > { %v790_v40 = vmul.f32 1.442695, %v789_v33  ;;  %v1201_v41 = vpop.f32.mrb[3].mxu1  ;;  %709 = vrot.lane.b32.xlu1 %v707_v36, %s1364_s29  ;;  %v698_v42 = vpop.f32.mrb[3].mxu0 }
 0x25d   : > { %806 = vst.msk [vmem:[%s1577_s26] sm:$0xf] %vm797_vm2, %v732_v37 }
 0x25e   : > { %1265 = vpow2.f32 %v790_v40 }
 0x260   : > { %727 = vrot.lane.b32.xlu1 %v725_v43, %s1364_s29  ;;  %s1366_s29 = smov 48  }
 0x268   : > { %v1266_v44 = vpop.eup %1265 }
 0x269   : > { %v792_v45 = vadd.f32 1.0, %v1266_v44 }
 0x26b   : > { %1267 = vrcp.f32 %v792_v45 }
 0x275   : > { %v1268_v46 = vpop.eup %1267 }
 0x276   : > { %v795_v47 = vmul.f32 %v1268_v46, %v783_v32 }
 0x278   : > { %v796_v48 = vpack.c.bf16 %v795_v47, %v795_v47 }
 0x27a   : > { %832 = vrot.lane.b32.xlu0 %v796_v48, %s1365_s18  ;;  %807 = vst.msk [vmem:[%s596_s14] sm:$0xf] %vm797_vm2, %v796_v48 }
 0x2ce   : > { %v710_v52 = vpop.permute.xlu1 %709 }
 0x2cf   : > { %v712_v53 = vadd.f32 %v710_v52, %v701_v50 }
 0x2d1   : > { %v713_v55 = vpack.c.bf16 %v712_v53, %v712_v53 }
 0x2d2   : > { %v728_v56 = vpop.permute.xlu1 %727 }
 0x2d3   : > { %v730_v57 = vadd.f32 %v728_v56, %v719_v54  ;;  %798 = vst.msk [vmem:[%s572_s28] sm:$0xf] %vm797_vm2, %v713_v55 }
 0x2d5   : > { %v1187_v58 = vpack.c.bf16 %v730_v57, %v730_v57 }
 0x2d7   : > { %802 = vrot.lane.b32.xlu1 %v1187_v58, %s1363_s30 }
 0x2db   : > { %811 = vrot.lane.b32.xlu1 %v713_v55, %s1365_s18 }
 0x2df   : > { %816 = vrot.lane.b32.xlu1 %v1187_v58, %s1366_s29 }
 0x2e3   : > { %824 = vrot.lane.b32.xlu1 %v732_v37, %s1365_s18 }
 0x2ec   : > { %v833_v59 = vpop.permute.xlu0 %832 }
 0x2ed   : > { %1180 = vst.msk [vmem:[%s596_s14 + $0x4] sm:$0xf] %vm797_vm2, %v833_v59 }
 0x349   : > { %v803_v60 = vpop.permute.xlu1 %802 }
 0x34a   : > { %805 = vst.msk [vmem:[%s580_s21] sm:$0xf] %vm797_vm2, %v803_v60 }
 0x34d   : > { %v812_v61 = vpop.permute.xlu1 %811 }
 0x34e   : > { %1175 = vst.msk [vmem:[%s572_s28 + $0x4] sm:$0xf] %vm797_vm2, %v812_v61 }
 0x351   : > { %v817_v62 = vpop.permute.xlu1 %816 }
 0x352   : > { %1176 = vst.msk [vmem:[%s580_s21 + $0x4] sm:$0xf] %vm797_vm2, %v817_v62 }
 0x355   : > { %v825_v63 = vpop.permute.xlu1 %824 }
 0x356   : > { %1178 = vst.msk [vmem:[%s1577_s26 + $0x4] sm:$0xf] %vm797_vm2, %v825_v63 }
 0x357 PF: > { %s25_s23 = sadd.s32 1, %s1355_s23   ;;  %s1637_s21 = smov %s1351_s22 }
 0x358   : > { %p22_p6 = scmp.ge.s32.totalorder %s25_s23, 4   ;;  %s1638_s22 = smov %s1640_s25 }
 0x35a   :  { %24 = sbr.rel (!%p22_p6) target bundleno = 3 (0x3), region = 147 }
 0x361   :  { %930 = vsyncpa [#allocation3], 1 }
 0x362   :  { %932 = vsyncpa [#allocation3 + $0x1], 1 }
 0x363   :  { %933 = vsyncpa [#allocation5], 1 }

// kernel: retnet_encoder_forward.8
= control target key start
LH: loop header
LB: loop body
LE: loop exit
PB: predicated region body
PF: predicated region fallthrough
CT: control target
= control target key end

     0   :  { %vm31_vm0 = vcmask 261120   ;;  %v329_v16 = vmov 0.0   ;;  %vm330_vm1 = vmmov 0   ;;  %vm203_vm2 = vcmask 523264   ;;  %s425_s0 = inlined_call_operand.vmem [shape: bf16[16,32], index: 0, kind: input, shape index: {}]   ;;  %s426_s3 = inlined_call_operand.vmem [shape: bf16[32,64], index: 3, kind: input, shape index: {}]   ;;  %s427_s1 = inlined_call_operand.vmem [shape: f32[1,32], index: 1, kind: input, shape index: {}]   ;;  %s428_s2 = inlined_call_operand.vmem [shape: f32[1,32], index: 2, kind: input, shape index: {}]   ;;  %s429_s5 = inlined_call_operand.vmem [shape: bf16[64,32], index: 5, kind: input, shape index: {}]   ;;  %s430_s4 = inlined_call_operand.vmem [shape: f32[1,64], index: 4, kind: input, shape index: {}]   ;;  %s431_s6 = inlined_call_operand.vmem [shape: f32[1,32], index: 6, kind: input, shape index: {}]   ;;  %s432_s7 = inlined_call_operand.vmem [shape: bf16[16,32], index: 7, kind: output, shape index: {}]  }
   0x1   :  { %v282_v0 = vld [vmem:[%s425_s0] sm:$0xff]   ;;  %293 = vmatprep.subr.bf16.mxu0 %v329_v16  ;;  %301 = vmatprep.subr.bf16.mxu1 %v329_v16  ;;  %v316_v17 = vld [vmem:[%s426_s3 + $0x8] sm:$0xff]   ;;  %v319_v37 = vld [vmem:[%s429_s5 + $0x10] sm:$0xff]   ;;  %vm258_vm3 = vcmask 257024  }
   0x2   :  { %v374_v1 = vunpack.c.l.bf16 %v282_v0  ;;  %v376_v2 = vunpack.c.h.bf16 %v282_v0  ;;  %v315_v15 = vld [vmem:[%s426_s3] sm:$0xff]   ;;  %297 = vmatprep.mubr.msk.bf16.mxu0 %vm330_vm1, %v329_v16  ;;  %309 = vmatprep.mubr.msk.bf16.mxu1 %vm330_vm1, %v329_v16  ;;  %v318_v36 = vld [vmem:[%s429_s5 + $0x8] sm:$0xff]   ;;  %v320_v38 = vld [vmem:[%s429_s5 + $0x18] sm:$0xff]  }
   0x3   :  { %294 = vmatpush3.bf16.msra.mxu0 %v315_v15  ;;  %v265_v26 = vld [vmem:[%s427_s1] ss:$0 sm:$0xff] }
   0x4   :  { %v32_v3 = vsel %vm31_vm0, %v374_v1, 0.0  ;;  %v35_v4 = vsel %vm31_vm0, %v376_v2, 0.0  ;;  %295 = vmatprep.subr.bf16.mxu0 %v329_v16  ;;  %v266_v30 = vld [vmem:[%s428_s2] ss:$0 sm:$0xff] }
   0x5   :  { %33 = vadd.xlane.f32.xlu0 %v32_v3  ;;  %v317_v35 = vld [vmem:[%s429_s5] sm:$0xff]  }
   0x6   :  { %302 = vmatpush3.bf16.msra.mxu1 %v317_v35  ;;  %v267_v39 = vld [vmem:[%s430_s4] ss:$0 sm:$0xff] }
   0x7   :  { %296 = vmatpush3.bf16.msra.mxu0 %v316_v17  ;;  %303 = vmatprep.subr.bf16.mxu1 %v329_v16  ;;  %v271_v3 = vld [vmem:[%s431_s6] ss:$0 sm:$0xff] }
   0x9   :  { %36 = vadd.xlane.f32.xlu0 %v35_v4 }
   0xa   :  { %304 = vmatpush3.bf16.msra.mxu1 %v318_v36 }
   0xb   :  { %305 = vmatprep.subr.bf16.mxu1 %v329_v16 }
   0xe   :  { %306 = vmatpush3.bf16.msra.mxu1 %v319_v37 }
   0xf   :  { %307 = vmatprep.subr.bf16.mxu1 %v329_v16 }
  0x12   :  { %308 = vmatpush3.bf16.msra.mxu1 %v320_v38 }
  0x92   :  { %v34_v5 = vpop.xlane.xlu0 %33 }
  0x93   :  { %v39_v6 = vmul.f32 0.03125, %v34_v5 }
  0x95   :  { %v41_v7 = vsub.f32 %v374_v1, %v39_v6 }
  0x96   :  { %v37_v8 = vpop.xlane.xlu0 %36 }
  0x97   :  { %v40_v9 = vmul.f32 0.03125, %v37_v8  ;;  %v43_v10 = vmul.f32 %v41_v7, %v41_v7 }
  0x99   :  { %v42_v11 = vsub.f32 %v376_v2, %v40_v9  ;;  %v45_v12 = vsel %vm31_vm0, %v43_v10, 0.0 }
  0x9a   :  { %46 = vadd.xlane.f32.xlu1 %v45_v12 }
  0x9b   :  { %v44_v13 = vmul.f32 %v42_v11, %v42_v11 }
  0x9d   :  { %v48_v14 = vsel %vm31_vm0, %v44_v13, 0.0 }
  0x9e   :  { %49 = vadd.xlane.f32.xlu1 %v48_v14 }
 0x127   :  { %v47_v18 = vpop.xlane.xlu1 %46 }
 0x128   :  { %v51_v19 = vmul.f32 0.03125, %v47_v18 }
 0x12a   :  { %v53_v20 = vadd.f32 1e-05, %v51_v19 }
 0x12b   :  { %v50_v21 = vpop.xlane.xlu1 %49 }
 0x12c   :  { %321 = vrsqrt.f32 %v53_v20  ;;  %v52_v22 = vmul.f32 0.03125, %v50_v21 }
 0x12e   :  { %v54_v23 = vadd.f32 1e-05, %v52_v22 }
 0x130   :  { %323 = vrsqrt.f32 %v54_v23 }
 0x136   :  { %v322_v24 = vpop.eup %321 }
 0x137   :  { %v57_v25 = vmul.f32 %v322_v24, %v41_v7 }
 0x139   :  { %v66_v29 = vmul.f32 %v265_v26, %v57_v25 }
 0x13a   :  { %v324_v27 = vpop.eup %323 }
 0x13b   :  { %v58_v28 = vmul.f32 %v324_v27, %v42_v11  ;;  %v75_v32 = vadd.f32 %v266_v30, %v66_v29 }
 0x13d   :  { %v67_v31 = vmul.f32 %v265_v26, %v58_v28 }
 0x13f   :  { %v76_v33 = vadd.f32 %v266_v30, %v67_v31 }
 0x141   :  { %v77_v34 = vpack.c.bf16 %v76_v33, %v75_v32 }
 0x143   :  { %298 = vmatmul.mubr.msk.bf16.vlgmr.msra.gmra.mrb[0].mxu0 %vm31_vm0, %v77_v34 }
 0x216   :  { %v138_v40 = vpop.f32.mrb[0].mxu0 }
 0x217   :  { %v139_v41 = vadd.f32 %v267_v39, %v138_v40  ;;  %v299_v42 = vpop.f32.mrb[1].mxu0 }
 0x218   :  { %v141_v43 = vpop.f32.mrb[2].mxu0 }
 0x219   :  { %v145_v44 = vmul.f32 %v139_v41, %v139_v41  ;;  %v142_v45 = vadd.f32 %v267_v39, %v141_v43  ;;  %v300_v46 = vpop.f32.mrb[3].mxu0 }
 0x21b   :  { %v147_v47 = vmul.f32 %v145_v44, %v139_v41  ;;  %v146_v48 = vmul.f32 %v142_v45, %v142_v45 }
 0x21d   :  { %v149_v49 = vmul.f32 0.044715, %v147_v47  ;;  %v148_v50 = vmul.f32 %v146_v48, %v142_v45 }
 0x21f   :  { %v151_v51 = vadd.f32 %v149_v49, %v139_v41  ;;  %v150_v52 = vmul.f32 0.044715, %v148_v50 }
 0x221   :  { %v153_v53 = vmul.f32 0.7978846, %v151_v51  ;;  %v152_v54 = vadd.f32 %v150_v52, %v142_v45 }
 0x223   :  { %325 = vtanh.f32 %v153_v53  ;;  %v154_v55 = vmul.f32 0.7978846, %v152_v54 }
 0x225   :  { %327 = vtanh.f32 %v154_v55 }
 0x22d   :  { %v326_v56 = vpop.eup %325 }
 0x22e   :  { %v157_v57 = vadd.f32 1.0, %v326_v56 }
 0x22f   :  { %v328_v58 = vpop.eup %327 }
 0x230   :  { %v159_v59 = vmul.f32 0.5, %v157_v57  ;;  %v158_v60 = vadd.f32 1.0, %v328_v58 }
 0x232   :  { %v160_v61 = vmul.f32 0.5, %v158_v60  ;;  %v161_v62 = vmul.f32 %v159_v59, %v139_v41 }
 0x234   :  { %v162_v63 = vmul.f32 %v160_v61, %v142_v45 }
 0x236   :  { %v163_v0 = vpack.c.bf16 %v162_v63, %v161_v62 }
 0x238   :  { %310 = vmatmul.mubr.msk.bf16.vlgmr.msra.gmra.mrb[0].mxu1 %vm203_vm2, %v163_v0 }
 0x30b   :  { %v241_v4 = vpop.f32.mrb[0].mxu1 }
 0x30c   :  { %v242_v5 = vadd.f32 %v271_v3, %v241_v4  ;;  %v311_v6 = vpop.f32.mrb[1].mxu1 }
 0x30d   :  { %v244_v7 = vpop.f32.mrb[2].mxu1 }
 0x30e   :  { %v248_v8 = vadd.f32 %v374_v1, %v242_v5  ;;  %v245_v9 = vadd.f32 %v271_v3, %v244_v7  ;;  %v312_v10 = vpop.f32.mrb[3].mxu1 }
 0x310   :  { %v279_v11 = vpack.c.bf16 %v248_v8, %v248_v8  ;;  %v249_v12 = vadd.f32 %v376_v2, %v245_v9 }
 0x312   :  { %259 = vst.msk [vmem:[%s432_s7] sm:$0xf] %vm258_vm3, %v279_v11  ;;  %v280_v13 = vpack.c.bf16 %v249_v12, %v249_v12 }
 0x314   :  { %260 = vst.msk [vmem:[%s432_s7 + $0x4] sm:$0xf] %vm258_vm3, %v280_v13 }

// kernel: retnet_encoder_forward.9
= control target key start
LH: loop header
LB: loop body
LE: loop exit
PB: predicated region body
PF: predicated region fallthrough
CT: control target
= control target key end

     0   :  { %vm25_vm0 = vcmask 261120   ;;  %v210_v16 = vmov 0.0   ;;  %vm211_vm1 = vmmov 0   ;;  %v161_v54 = vlaneseq  ;;  %s271_s0 = inlined_call_operand.vmem [shape: bf16[16,32], index: 0, kind: input, shape index: {}]   ;;  %s272_s3 = inlined_call_operand.vmem [shape: bf16[32,16], index: 3, kind: input, shape index: {}]   ;;  %s273_s1 = inlined_call_operand.vmem [shape: f32[1,32], index: 1, kind: input, shape index: {}]   ;;  %s274_s2 = inlined_call_operand.vmem [shape: f32[1,32], index: 2, kind: input, shape index: {}]   ;;  %s275_s4 = inlined_call_operand.vmem [shape: f32[1,16], index: 4, kind: input, shape index: {}]   ;;  %s276_s5 = inlined_call_operand.vmem [shape: f32[16,16], index: 5, kind: output, shape index: {}]  }
   0x1   :  { %v180_v0 = vld [vmem:[%s271_s0] sm:$0xff]   ;;  %186 = vmatprep.subr.bf16.mxu0 %v210_v16  ;;  %v197_v17 = vld [vmem:[%s272_s3 + $0x8] sm:$0xff]   ;;  %190 = vmatprep.mubr.msk.bf16.mxu0 %vm211_vm1, %v210_v16  ;;  %vm166_vm3 = vcmask 130048  }
   0x2   :  { %v181_v1 = vunpack.c.l.bf16 %v180_v0  ;;  %v182_v2 = vunpack.c.h.bf16 %v180_v0  ;;  %v196_v15 = vld [vmem:[%s272_s3] sm:$0xff]   ;;  %v162_v56 = vand.u32 127, %v161_v54 }
   0x3   :  { %187 = vmatpush3.bf16.msra.mxu0 %v196_v15  ;;  %v173_v26 = vld [vmem:[%s273_s1] ss:$0 sm:$0xff] }
   0x4   :  { %v26_v3 = vsel %vm25_vm0, %v181_v1, 0.0  ;;  %v29_v4 = vsel %vm25_vm0, %v182_v2, 0.0  ;;  %188 = vmatprep.subr.bf16.mxu0 %v210_v16  ;;  %v174_v30 = vld [vmem:[%s274_s2] ss:$0 sm:$0xff]  ;;  %vm163_vm2 = vcmp.lt.s32.totalorder %v162_v56, 8 }
   0x5   :  { %27 = vadd.xlane.f32.xlu0 %v26_v3  ;;  %v175_v35 = vld [vmem:[%s275_s4] ss:$0 sm:$0xff] }
   0x7   :  { %189 = vmatpush3.bf16.msra.mxu0 %v197_v17 }
   0x9   :  { %30 = vadd.xlane.f32.xlu0 %v29_v4 }
  0x92   :  { %v28_v5 = vpop.xlane.xlu0 %27 }
  0x93   :  { %v33_v6 = vmul.f32 0.03125, %v28_v5 }
  0x95   :  { %v35_v7 = vsub.f32 %v181_v1, %v33_v6 }
  0x96   :  { %v31_v8 = vpop.xlane.xlu0 %30 }
  0x97   :  { %v34_v9 = vmul.f32 0.03125, %v31_v8  ;;  %v37_v10 = vmul.f32 %v35_v7, %v35_v7 }
  0x99   :  { %v36_v11 = vsub.f32 %v182_v2, %v34_v9  ;;  %v39_v12 = vsel %vm25_vm0, %v37_v10, 0.0 }
  0x9a   :  { %40 = vadd.xlane.f32.xlu1 %v39_v12 }
  0x9b   :  { %v38_v13 = vmul.f32 %v36_v11, %v36_v11 }
  0x9d   :  { %v42_v14 = vsel %vm25_vm0, %v38_v13, 0.0 }
  0x9e   :  { %43 = vadd.xlane.f32.xlu1 %v42_v14 }
 0x127   :  { %v41_v18 = vpop.xlane.xlu1 %40 }
 0x128   :  { %v45_v19 = vmul.f32 0.03125, %v41_v18 }
 0x12a   :  { %v47_v20 = vadd.f32 1e-05, %v45_v19 }
 0x12b   :  { %v44_v21 = vpop.xlane.xlu1 %43 }
 0x12c   :  { %198 = vrsqrt.f32 %v47_v20  ;;  %v46_v22 = vmul.f32 0.03125, %v44_v21 }
 0x12e   :  { %v48_v23 = vadd.f32 1e-05, %v46_v22 }
 0x130   :  { %200 = vrsqrt.f32 %v48_v23 }
 0x136   :  { %v199_v24 = vpop.eup %198 }
 0x137   :  { %v51_v25 = vmul.f32 %v199_v24, %v35_v7 }
 0x139   :  { %v60_v29 = vmul.f32 %v173_v26, %v51_v25 }
 0x13a   :  { %v201_v27 = vpop.eup %200 }
 0x13b   :  { %v52_v28 = vmul.f32 %v201_v27, %v36_v11  ;;  %v69_v32 = vadd.f32 %v174_v30, %v60_v29 }
 0x13d   :  { %v61_v31 = vmul.f32 %v173_v26, %v52_v28 }
 0x13f   :  { %v70_v33 = vadd.f32 %v174_v30, %v61_v31 }
 0x141   :  { %v71_v34 = vpack.c.bf16 %v70_v33, %v69_v32 }
 0x143   :  { %191 = vmatmul.mubr.msk.bf16.vlgmr.msra.gmra.mrb[0].mxu0 %vm25_vm0, %v71_v34 }
 0x216   :  { %v132_v36 = vpop.f32.mrb[0].mxu0 }
 0x217   :  { %v133_v37 = vadd.f32 %v175_v35, %v132_v36  ;;  %v192_v38 = vpop.f32.mrb[1].mxu0 }
 0x218   :  { %v135_v39 = vpop.f32.mrb[2].mxu0 }
 0x219   :  { %v139_v40 = vmul.f32 0.5, %v133_v37  ;;  %v136_v41 = vadd.f32 %v175_v35, %v135_v39  ;;  %v193_v42 = vpop.f32.mrb[3].mxu0 }
 0x21b   :  { %v143_v43 = vand.u32 2147483647, %v139_v40  ;;  %v140_v44 = vmul.f32 0.5, %v136_v41  ;;  %v141_v57 = vmax.f32 %v139_v40, 0.0 }
 0x21d   :  { %v145_v45 = vsub.f32 0.0, %v143_v43  ;;  %v144_v46 = vand.u32 2147483647, %v140_v44  ;;  %v142_v61 = vmax.f32 %v140_v44, 0.0 }
 0x21f   :  { %v147_v47 = vmul.f32 1.442695, %v145_v45  ;;  %v146_v48 = vsub.f32 0.0, %v144_v46 }
 0x221   :  { %202 = vpow2.f32 %v147_v47  ;;  %v149_v49 = vmul.f32 1.442695, %v146_v48 }
 0x223   :  { %204 = vpow2.f32 %v149_v49 }
 0x22b   :  { %v203_v50 = vpop.eup %202 }
 0x22c   :  { %v151_v51 = vadd.f32 1.0, %v203_v50 }
 0x22d   :  { %v205_v52 = vpop.eup %204 }
 0x22e   :  { %206 = vlog2.f32 %v151_v51  ;;  %v152_v53 = vadd.f32 1.0, %v205_v52 }
 0x230   :  { %208 = vlog2.f32 %v152_v53 }
 0x238   :  { %v207_v55 = vpop.eup %206 }
 0x239   :  { %v154_v58 = vmul.f32 0.6931472, %v207_v55 }
 0x23a   :  { %v209_v59 = vpop.eup %208 }
 0x23b   :  { %v157_v60 = vadd.f32 %v154_v58, %v141_v57  ;;  %v156_v62 = vmul.f32 0.6931472, %v209_v59 }
 0x23d   :  { %v159_v63 = vadd.f32 0.001, %v157_v60  ;;  %v158_v0 = vadd.f32 %v156_v62, %v142_v61 }
 0x23f   :  { %v164_v1 = vsel %vm163_vm2, %v133_v37, %v159_v63  ;;  %v160_v2 = vadd.f32 0.001, %v158_v0 }
 0x240   :  { %167 = vst.msk [vmem:[%s276_s5] sm:$0xff] %vm166_vm3, %v164_v1 }
 0x241   :  { %v165_v3 = vsel %vm163_vm2, %v136_v41, %v160_v2 }
 0x242   :  { %168 = vst.msk [vmem:[%s276_s5 + $0x8] sm:$0xff] %vm166_vm3, %v165_v3 }

</bundles_post_ra>
